<compile_context>
chip_gen: v7x
topology: tpu7x:2x2x1
jax: 0.10.0
libtpu: 0.0.40
codegen_flags: <defaults>
</compile_context>

<pallas_src>
import functools

import jax
import jax.numpy as jnp
from jax.experimental import pallas as pl
from jax.experimental.pallas import tpu as pltpu


# ----------------------------- Pallas kernel --------------------------------
def bilinear_kernel(x_ref, w_ref, o_ref):
    """y = einsum('bi,bj,ijo->bo', x, x, W) for one batch tile.

    x_ref: (TB, n)        VMEM tile of the input
    w_ref: (n*n, out_p)   pre-flattened, lane-dense weight (resident in VMEM)
    o_ref: (TB, out_p)    lane-dense output tile (padded to a 128 multiple)
    """
    x = x_ref[...].astype(jnp.float32)                       # (TB, n)
    n = x_ref.shape[1]

    # Build x2[b, i*n + j] = x[b, i] * x[b, j] once, lane-dense (width n*n).
    # Block i (lanes i*n .. i*n+n-1) is x[b, :] scaled by x[b, i].  This is a
    # one-time set of cheap lane-broadcast multiplies + a single concat; all
    # the FLOPs then go through one deep MXU matmul below (K = n*n).
    x2 = jnp.concatenate([x * x[:, i:i + 1] for i in range(n)], axis=1)

    # Single lane-dense MXU matmul: (TB, n*n) @ (n*n, out_p), f32 accumulate.
    y = jnp.dot(x2, w_ref[...], preferred_element_type=jnp.float32)
    o_ref[...] = y.astype(o_ref.dtype)


# ------------------------------- wrapper -------------------------------------
@functools.partial(jax.jit, static_argnames=("tb",))
def bilinear_pallas(x, w, *, tb=None):
    B, n = x.shape
    assert w.shape[0] == n and w.shape[1] == n, "weight must be (n, n, out)"
    out = w.shape[-1]

    # Lane-dense weight: row-major flatten (i, j) -> i*n + j (matches x2),
    # then zero-pad the output columns to a multiple of 128.
    out_p = ((out + 127) // 128) * 128
    w_flat = w.reshape(n * n, out)
    if out_p != out:
        w_flat = jnp.pad(w_flat, ((0, 0), (0, out_p - out)))

    if tb is None:
        # Large batch tile; keep >=2 (even) grid steps when possible so both
        # v7x TensorCores get work, and cap the tile to stay VMEM-friendly.
        tb = B // 2 if (B >= 16 and B % 2 == 0) else B
        tb = min(tb, 512)
        while B % tb:
            tb -= 1
    assert B % tb == 0, "batch must be divisible by the batch tile"

    y_padded = pl.pallas_call(
        bilinear_kernel,
        out_shape=jax.ShapeDtypeStruct((B, out_p), x.dtype),
        grid=(B // tb,),
        in_specs=[
            pl.BlockSpec((tb, n), lambda i: (i, 0)),             # x tile
            pl.BlockSpec((n * n, out_p), lambda i: (0, 0)),      # full weight
        ],
        out_specs=pl.BlockSpec((tb, out_p), lambda i: (i, 0)),
        compiler_params=pltpu.CompilerParams(
            dimension_semantics=("parallel",),
            vmem_limit_bytes=32 * 1024 * 1024,
        ),
    )(x, w_flat)
    return y_padded[:, :out]


# ------------------------ deterministic parameter init -----------------------
def make_trl_weight(key, n, out, rank_frac=0.05, target_std=0.00075):
    """Low-rank Tucker-decomposed weight (n, n, out), reconstructed to full."""
    r1 = max(1, int(round(rank_frac * n)))
    r2 = max(1, int(round(rank_frac * n)))
    r3 = max(1, int(round(rank_frac * out)))
    k_core, k1, k2, k3 = jax.random.split(key, 4)
    core = jax.random.normal(k_core, (r1, r2, r3), jnp.float32)
    u1 = jax.random.normal(k1, (n, r1), jnp.float32)
    u2 = jax.random.normal(k2, (n, r2), jnp.float32)
    u3 = jax.random.normal(k3, (out, r3), jnp.float32)
    w = jnp.einsum("abc,ia,jb,oc->ijo", core, u1, u2, u3)
    w = w / (jnp.std(w) + 1e-12) * target_std        # mimic .normal_(std=0.00075)
    return w


# --------------------------------- main ---------------------------------------
if __name__ == "__main__":
    key = jax.random.PRNGKey(0)
    k_x, k_w = jax.random.split(key)

    B, n = 64, 32          # small shapes; out defaults to n in the module
    out = n

    x = jax.random.normal(k_x, (B, n), jnp.float32)
    w = make_trl_weight(k_w, n, out, rank_frac=0.05, target_std=0.00075)

    y = bilinear_pallas(x, w, tb=32)   # grid=(2,): big tiles, 2 parallel steps
    y = jax.block_until_ready(y)

    # pure-JAX reference: y[b,o] = sum_ij x[b,i] x[b,j] W[i,j,o]
    y_ref = jnp.einsum("bi,bj,ijo->bo", x, x, w)

    assert y.shape == (B, out)
    err = float(jnp.max(jnp.abs(y - y_ref)))
    assert jnp.allclose(y, y_ref, atol=1e-4, rtol=1e-4), f"max abs err = {err}"

    print("KERNEL_OK")
</pallas_src>

<mosaic_0001>
module attributes {stable_mosaic.version = 11 : i64} {
  func.func @bilinear_kernel(%arg0: i32, %arg1: memref<32x32xf32, #tpu.memory_space<vmem>>, %arg2: memref<1024x128xf32, #tpu.memory_space<vmem>>, %arg3: memref<32x128xf32, #tpu.memory_space<vmem>>) attributes {dimension_semantics = [#tpu.dimension_semantics<parallel>], iteration_bounds = array<i64: 2>, scalar_prefetch = 0 : i64, scratch_operands = 0 : i64, tpu.core_type = #tpu.core_type<tc>, window_params = [{transform_indices = @transform_0, window_bounds = array<i64: 32, 32>}, {pipeline_mode = #tpu.pipeline_mode<synchronous>, transform_indices = @transform_1, window_bounds = array<i64: 1024, 128>}, {transform_indices = @transform_2, window_bounds = array<i64: 32, 128>}]} {
    %c0 = arith.constant 0 : index
    %c0_0 = arith.constant 0 : index
    %0 = vector.load %arg1[%c0, %c0_0] : memref<32x32xf32, #tpu.memory_space<vmem>>, vector<32x32xf32>
    %1 = vector.extract_strided_slice %0 {offsets = [0, 0], sizes = [32, 1], strides = [1, 1]} : vector<32x32xf32> to vector<32x1xf32>
    %2 = vector.broadcast %1 : vector<32x1xf32> to vector<32x32xf32>
    %3 = arith.mulf %0, %2 : vector<32x32xf32>
    %4 = vector.extract_strided_slice %0 {offsets = [0, 1], sizes = [32, 1], strides = [1, 1]} : vector<32x32xf32> to vector<32x1xf32>
    %5 = vector.broadcast %4 : vector<32x1xf32> to vector<32x32xf32>
    %6 = arith.mulf %0, %5 : vector<32x32xf32>
    %7 = vector.extract_strided_slice %0 {offsets = [0, 2], sizes = [32, 1], strides = [1, 1]} : vector<32x32xf32> to vector<32x1xf32>
    %8 = vector.broadcast %7 : vector<32x1xf32> to vector<32x32xf32>
    %9 = arith.mulf %0, %8 : vector<32x32xf32>
    %10 = vector.extract_strided_slice %0 {offsets = [0, 3], sizes = [32, 1], strides = [1, 1]} : vector<32x32xf32> to vector<32x1xf32>
    %11 = vector.broadcast %10 : vector<32x1xf32> to vector<32x32xf32>
    %12 = arith.mulf %0, %11 : vector<32x32xf32>
    %13 = vector.extract_strided_slice %0 {offsets = [0, 4], sizes = [32, 1], strides = [1, 1]} : vector<32x32xf32> to vector<32x1xf32>
    %14 = vector.broadcast %13 : vector<32x1xf32> to vector<32x32xf32>
    %15 = arith.mulf %0, %14 : vector<32x32xf32>
    %16 = vector.extract_strided_slice %0 {offsets = [0, 5], sizes = [32, 1], strides = [1, 1]} : vector<32x32xf32> to vector<32x1xf32>
    %17 = vector.broadcast %16 : vector<32x1xf32> to vector<32x32xf32>
    %18 = arith.mulf %0, %17 : vector<32x32xf32>
    %19 = vector.extract_strided_slice %0 {offsets = [0, 6], sizes = [32, 1], strides = [1, 1]} : vector<32x32xf32> to vector<32x1xf32>
    %20 = vector.broadcast %19 : vector<32x1xf32> to vector<32x32xf32>
    %21 = arith.mulf %0, %20 : vector<32x32xf32>
    %22 = vector.extract_strided_slice %0 {offsets = [0, 7], sizes = [32, 1], strides = [1, 1]} : vector<32x32xf32> to vector<32x1xf32>
    %23 = vector.broadcast %22 : vector<32x1xf32> to vector<32x32xf32>
    %24 = arith.mulf %0, %23 : vector<32x32xf32>
    %25 = vector.extract_strided_slice %0 {offsets = [0, 8], sizes = [32, 1], strides = [1, 1]} : vector<32x32xf32> to vector<32x1xf32>
    %26 = vector.broadcast %25 : vector<32x1xf32> to vector<32x32xf32>
    %27 = arith.mulf %0, %26 : vector<32x32xf32>
    %28 = vector.extract_strided_slice %0 {offsets = [0, 9], sizes = [32, 1], strides = [1, 1]} : vector<32x32xf32> to vector<32x1xf32>
    %29 = vector.broadcast %28 : vector<32x1xf32> to vector<32x32xf32>
    %30 = arith.mulf %0, %29 : vector<32x32xf32>
    %31 = vector.extract_strided_slice %0 {offsets = [0, 10], sizes = [32, 1], strides = [1, 1]} : vector<32x32xf32> to vector<32x1xf32>
    %32 = vector.broadcast %31 : vector<32x1xf32> to vector<32x32xf32>
    %33 = arith.mulf %0, %32 : vector<32x32xf32>
    %34 = vector.extract_strided_slice %0 {offsets = [0, 11], sizes = [32, 1], strides = [1, 1]} : vector<32x32xf32> to vector<32x1xf32>
    %35 = vector.broadcast %34 : vector<32x1xf32> to vector<32x32xf32>
    %36 = arith.mulf %0, %35 : vector<32x32xf32>
    %37 = vector.extract_strided_slice %0 {offsets = [0, 12], sizes = [32, 1], strides = [1, 1]} : vector<32x32xf32> to vector<32x1xf32>
    %38 = vector.broadcast %37 : vector<32x1xf32> to vector<32x32xf32>
    %39 = arith.mulf %0, %38 : vector<32x32xf32>
    %40 = vector.extract_strided_slice %0 {offsets = [0, 13], sizes = [32, 1], strides = [1, 1]} : vector<32x32xf32> to vector<32x1xf32>
    %41 = vector.broadcast %40 : vector<32x1xf32> to vector<32x32xf32>
    %42 = arith.mulf %0, %41 : vector<32x32xf32>
    %43 = vector.extract_strided_slice %0 {offsets = [0, 14], sizes = [32, 1], strides = [1, 1]} : vector<32x32xf32> to vector<32x1xf32>
    %44 = vector.broadcast %43 : vector<32x1xf32> to vector<32x32xf32>
    %45 = arith.mulf %0, %44 : vector<32x32xf32>
    %46 = vector.extract_strided_slice %0 {offsets = [0, 15], sizes = [32, 1], strides = [1, 1]} : vector<32x32xf32> to vector<32x1xf32>
    %47 = vector.broadcast %46 : vector<32x1xf32> to vector<32x32xf32>
    %48 = arith.mulf %0, %47 : vector<32x32xf32>
    %49 = vector.extract_strided_slice %0 {offsets = [0, 16], sizes = [32, 1], strides = [1, 1]} : vector<32x32xf32> to vector<32x1xf32>
    %50 = vector.broadcast %49 : vector<32x1xf32> to vector<32x32xf32>
    %51 = arith.mulf %0, %50 : vector<32x32xf32>
    %52 = vector.extract_strided_slice %0 {offsets = [0, 17], sizes = [32, 1], strides = [1, 1]} : vector<32x32xf32> to vector<32x1xf32>
    %53 = vector.broadcast %52 : vector<32x1xf32> to vector<32x32xf32>
    %54 = arith.mulf %0, %53 : vector<32x32xf32>
    %55 = vector.extract_strided_slice %0 {offsets = [0, 18], sizes = [32, 1], strides = [1, 1]} : vector<32x32xf32> to vector<32x1xf32>
    %56 = vector.broadcast %55 : vector<32x1xf32> to vector<32x32xf32>
    %57 = arith.mulf %0, %56 : vector<32x32xf32>
    %58 = vector.extract_strided_slice %0 {offsets = [0, 19], sizes = [32, 1], strides = [1, 1]} : vector<32x32xf32> to vector<32x1xf32>
    %59 = vector.broadcast %58 : vector<32x1xf32> to vector<32x32xf32>
    %60 = arith.mulf %0, %59 : vector<32x32xf32>
    %61 = vector.extract_strided_slice %0 {offsets = [0, 20], sizes = [32, 1], strides = [1, 1]} : vector<32x32xf32> to vector<32x1xf32>
    %62 = vector.broadcast %61 : vector<32x1xf32> to vector<32x32xf32>
    %63 = arith.mulf %0, %62 : vector<32x32xf32>
    %64 = vector.extract_strided_slice %0 {offsets = [0, 21], sizes = [32, 1], strides = [1, 1]} : vector<32x32xf32> to vector<32x1xf32>
    %65 = vector.broadcast %64 : vector<32x1xf32> to vector<32x32xf32>
    %66 = arith.mulf %0, %65 : vector<32x32xf32>
    %67 = vector.extract_strided_slice %0 {offsets = [0, 22], sizes = [32, 1], strides = [1, 1]} : vector<32x32xf32> to vector<32x1xf32>
    %68 = vector.broadcast %67 : vector<32x1xf32> to vector<32x32xf32>
    %69 = arith.mulf %0, %68 : vector<32x32xf32>
    %70 = vector.extract_strided_slice %0 {offsets = [0, 23], sizes = [32, 1], strides = [1, 1]} : vector<32x32xf32> to vector<32x1xf32>
    %71 = vector.broadcast %70 : vector<32x1xf32> to vector<32x32xf32>
    %72 = arith.mulf %0, %71 : vector<32x32xf32>
    %73 = vector.extract_strided_slice %0 {offsets = [0, 24], sizes = [32, 1], strides = [1, 1]} : vector<32x32xf32> to vector<32x1xf32>
    %74 = vector.broadcast %73 : vector<32x1xf32> to vector<32x32xf32>
    %75 = arith.mulf %0, %74 : vector<32x32xf32>
    %76 = vector.extract_strided_slice %0 {offsets = [0, 25], sizes = [32, 1], strides = [1, 1]} : vector<32x32xf32> to vector<32x1xf32>
    %77 = vector.broadcast %76 : vector<32x1xf32> to vector<32x32xf32>
    %78 = arith.mulf %0, %77 : vector<32x32xf32>
    %79 = vector.extract_strided_slice %0 {offsets = [0, 26], sizes = [32, 1], strides = [1, 1]} : vector<32x32xf32> to vector<32x1xf32>
    %80 = vector.broadcast %79 : vector<32x1xf32> to vector<32x32xf32>
    %81 = arith.mulf %0, %80 : vector<32x32xf32>
    %82 = vector.extract_strided_slice %0 {offsets = [0, 27], sizes = [32, 1], strides = [1, 1]} : vector<32x32xf32> to vector<32x1xf32>
    %83 = vector.broadcast %82 : vector<32x1xf32> to vector<32x32xf32>
    %84 = arith.mulf %0, %83 : vector<32x32xf32>
    %85 = vector.extract_strided_slice %0 {offsets = [0, 28], sizes = [32, 1], strides = [1, 1]} : vector<32x32xf32> to vector<32x1xf32>
    %86 = vector.broadcast %85 : vector<32x1xf32> to vector<32x32xf32>
    %87 = arith.mulf %0, %86 : vector<32x32xf32>
    %88 = vector.extract_strided_slice %0 {offsets = [0, 29], sizes = [32, 1], strides = [1, 1]} : vector<32x32xf32> to vector<32x1xf32>
    %89 = vector.broadcast %88 : vector<32x1xf32> to vector<32x32xf32>
    %90 = arith.mulf %0, %89 : vector<32x32xf32>
    %91 = vector.extract_strided_slice %0 {offsets = [0, 30], sizes = [32, 1], strides = [1, 1]} : vector<32x32xf32> to vector<32x1xf32>
    %92 = vector.broadcast %91 : vector<32x1xf32> to vector<32x32xf32>
    %93 = arith.mulf %0, %92 : vector<32x32xf32>
    %94 = vector.extract_strided_slice %0 {offsets = [0, 31], sizes = [32, 1], strides = [1, 1]} : vector<32x32xf32> to vector<32x1xf32>
    %95 = vector.broadcast %94 : vector<32x1xf32> to vector<32x32xf32>
    %96 = arith.mulf %0, %95 : vector<32x32xf32>
    %97 = tpu.concatenate %3, %6, %9, %12, %15, %18, %21, %24, %27, %30, %33, %36, %39, %42, %45, %48 in 1 : vector<32x32xf32>, vector<32x32xf32>, vector<32x32xf32>, vector<32x32xf32>, vector<32x32xf32>, vector<32x32xf32>, vector<32x32xf32>, vector<32x32xf32>, vector<32x32xf32>, vector<32x32xf32>, vector<32x32xf32>, vector<32x32xf32>, vector<32x32xf32>, vector<32x32xf32>, vector<32x32xf32>, vector<32x32xf32> -> vector<32x512xf32>
    %98 = tpu.concatenate %51, %54, %57, %60, %63, %66, %69, %72, %75, %78, %81, %84, %87, %90, %93, %96 in 1 : vector<32x32xf32>, vector<32x32xf32>, vector<32x32xf32>, vector<32x32xf32>, vector<32x32xf32>, vector<32x32xf32>, vector<32x32xf32>, vector<32x32xf32>, vector<32x32xf32>, vector<32x32xf32>, vector<32x32xf32>, vector<32x32xf32>, vector<32x32xf32>, vector<32x32xf32>, vector<32x32xf32>, vector<32x32xf32> -> vector<32x512xf32>
    %99 = tpu.concatenate %97, %98 in 1 : vector<32x512xf32>, vector<32x512xf32> -> vector<32x1024xf32>
    %c0_1 = arith.constant 0 : index
    %c0_2 = arith.constant 0 : index
    %100 = vector.load %arg2[%c0_1, %c0_2] : memref<1024x128xf32, #tpu.memory_space<vmem>>, vector<1024x128xf32>
    %cst = arith.constant dense<0.000000e+00> : vector<32x128xf32>
    %101 = tpu.matmul %99, %100, %cst {dimension_numbers = #tpu.dot_dimension_numbers<[1], [0], [0], [1], [0, 0, 1, 1], [], []>} : vector<32x1024xf32>, vector<1024x128xf32>, vector<32x128xf32> -> vector<32x128xf32>
    %c0_3 = arith.constant 0 : index
    %c0_4 = arith.constant 0 : index
    %102 = vector.load %arg3[%c0_3, %c0_4] : memref<32x128xf32, #tpu.memory_space<vmem>>, vector<32x128xf32>
    tpu.vector_store %arg3[%c0_3, %c0_4], %101 {strides = array<i32>} : memref<32x128xf32, #tpu.memory_space<vmem>>, vector<32x128xf32>,
    return
  }
  func.func @transform_0(%arg0: i32) -> (i32, i32) {
    %c0_i32 = arith.constant 0 : i32
    %c0_i32_0 = arith.constant 0 : i32
    return %arg0, %c0_i32 : i32, i32
  }
  func.func @transform_1(%arg0: i32) -> (i32, i32) {
    %c0_i32 = arith.constant 0 : i32
    %c0_i32_0 = arith.constant 0 : i32
    %c0_i32_1 = arith.constant 0 : i32
    return %c0_i32, %c0_i32_0 : i32, i32
  }
  func.func @transform_2(%arg0: i32) -> (i32, i32) {
    %c0_i32 = arith.constant 0 : i32
    %c0_i32_0 = arith.constant 0 : i32
    return %arg0, %c0_i32 : i32, i32
  }
}

</mosaic_0001>

<bundles_post_ra>
// kernel: bilinear_pallas.1
= control target key start
LH: loop header
LB: loop body
LE: loop exit
PB: predicated region body
PF: predicated region fallthrough
CT: control target
= control target key end

     0   :  { %s2551_s9 = smov 0   ;;  %s3788_s0 = inlined_call_operand.vmem [shape: f32[64,32], index: 0, kind: input, shape index: {}]   ;;  %s3789_s1 = inlined_call_operand.vmem [shape: f32[1024,128], index: 1, kind: input, shape index: {}]   ;;  %s3790_s2 = inlined_call_operand.vmem [shape: f32[64,128], index: 2, kind: output, shape index: {}]  }
   0x1 LB: > { %s1806_s10 = sadd.s32 4294967295, %s2499_s9   ;;  %p1810_p0 = scmp.ge.s32.totalorder %s2499_s9, 1  ;;  %s2499_s9 = sphi %s2551_s9, %s12_s9  }
   0x2   : > { %p113_p1 = scmp.lt.s32.totalorder %s2499_s9, 3 }
   0x4   : > { %p114_p2 = pnand %p1810_p0, %p113_p1 }
   0x6   : > { %117 = sbr.rel (%p114_p2) target bundleno = 832 (0x340), region = 28 }
   0xd   : > { %s1811_s11 = sshll.u32 %s1806_s10, 2  ;;  %v2501_v0 = vmov 0   ;;  %v2502_v5 = vmov 1   ;;  %v2503_v6 = vmov 2   ;;  %v2504_v7 = vmov 3   ;;  %s2530_s16 = smov 32  }
   0xe   : > { %2165 = vset.pattern.permute.xlu1 %v2501_v0  ;;  %2164 = vset.pattern.permute.xlu0 %v2501_v0  ;;  %p136_p3 = scmp.lt.s32.totalorder %s1811_s11, 7  ;;  %v2505_v8 = vmov 4   ;;  %v2506_v9 = vmov 5   ;;  %v2507_v10 = vmov 6   ;;  %v2508_v11 = vmov 7   ;;  %s2531_s17 = smov 96  }
   0xf   : > { %v2509_v12 = vmov 8   ;;  %v2510_v13 = vmov 9   ;;  %v2511_v14 = vmov 10   ;;  %v2512_v15 = vmov 11   ;;  %s2533_s18 = smov 64  }
  0x10   : > { %s3844_s11 = smov (!%p136_p3, %s1811_s11), 7  ;;  %v2513_v16 = vmov 12   ;;  %v2514_v17 = vmov 13   ;;  %v2515_v18 = vmov 14   ;;  %v2516_v19 = vmov 15  }
  0x11   : > { %s1812_s12 = sshll.u32 %s3844_s11, 3  ;;  %v2517_v20 = vmov 16   ;;  %v2518_v21 = vmov 17   ;;  %v2519_v24 = vmov 18   ;;  %v2520_v27 = vmov 19  }
  0x12   : > { %s2567_s15 = scalar_lea.vmem %s3788_s0, %s1812_s12  ;;  %v2521_v32 = vmov 20   ;;  %v3797_v35 = vmov 25   ;;  %v3793_v39 = vmov 31   ;;  %v3791_v42 = vmov 23  }
  0x13   : > { %v2570_v1 = vld [vmem:[%s2567_s15 + $0x10] sm:$0xff]  ;;  %v2573_v2 = vld [vmem:[%s2567_s15] sm:$0xff]  ;;  %v2578_v3 = vld [vmem:[%s2567_s15 + $0x18] sm:$0xff]  ;;  %v3795_v45 = vmov 30   ;;  %v2526_v48 = vmov 21   ;;  %v2527_v53 = vmov 22  }
  0x14   : > { %163 = vperm.xlu1 %2165, %v2570_v1   ;;  %153 = vperm.xlu0 %2164, %v2573_v2   ;;  %v2581_v4 = vld [vmem:[%s2567_s15 + $0x8] sm:$0xff]  ;;  %v3799_v60 = vmov 29   ;;  %vm987_vm0 = vcmask 261120   ;;  %vm992_vm1 = vcmask 523264   ;;  %vm997_vm2 = vcmask 785408  }
  0x18   : > { %168 = vperm.xlu1 %2165, %v2578_v3   ;;  %158 = vperm.xlu0 %2164, %v2581_v4  }
  0x1c   : > { %2167 = vset.pattern.permute.xlu1 %v2502_v5  ;;  %2166 = vset.pattern.permute.xlu0 %v2502_v5 }
  0x1d   : > { %180 = vperm.xlu1 %2167, %v2581_v4   ;;  %176 = vperm.xlu0 %2166, %v2573_v2  }
  0x21   : > { %184 = vperm.xlu1 %2167, %v2570_v1   ;;  %188 = vperm.xlu0 %2166, %v2578_v3  }
  0x25   : > { %2168 = vset.pattern.permute.xlu1 %v2503_v6  ;;  %2169 = vset.pattern.permute.xlu0 %v2503_v6 }
  0x26   : > { %196 = vperm.xlu1 %2168, %v2573_v2   ;;  %200 = vperm.xlu0 %2169, %v2581_v4  }
  0x2a   : > { %204 = vperm.xlu1 %2168, %v2570_v1   ;;  %2170 = vset.pattern.permute.xlu0 %v2504_v7 }
  0x2b   : > { %216 = vperm.xlu0 %2170, %v2573_v2  }
  0x2e   : > { %208 = vperm.xlu1 %2168, %v2578_v3  }
  0x2f   : > { %228 = vperm.xlu0 %2170, %v2578_v3  }
  0x32   : > { %2171 = vset.pattern.permute.xlu1 %v2504_v7  ;;  %v3800_v7 = vmov 26  }
  0x33   : > { %220 = vperm.xlu1 %2171, %v2581_v4   ;;  %2173 = vset.pattern.permute.xlu0 %v2505_v8 }
  0x34   : > { %240 = vperm.xlu0 %2173, %v2581_v4  }
  0x37   : > { %224 = vperm.xlu1 %2171, %v2570_v1  }
  0x38   : > { %2174 = vset.pattern.permute.xlu0 %v2506_v9 }
  0x39   : > { %256 = vperm.xlu0 %2174, %v2573_v2  }
  0x3b   : > { %2172 = vset.pattern.permute.xlu1 %v2505_v8 }
  0x3c   : > { %236 = vperm.xlu1 %2172, %v2573_v2  }
  0x3d   : > { %268 = vperm.xlu0 %2174, %v2578_v3  }
  0x40   : > { %244 = vperm.xlu1 %2172, %v2570_v1  }
  0x41   : > { %2177 = vset.pattern.permute.xlu0 %v2507_v10 }
  0x42   : > { %280 = vperm.xlu0 %2177, %v2581_v4  }
  0x44   : > { %248 = vperm.xlu1 %2172, %v2578_v3  }
  0x46   : > { %2178 = vset.pattern.permute.xlu0 %v2508_v11 }
  0x47   : > { %296 = vperm.xlu0 %2178, %v2573_v2  }
  0x48   : > { %2175 = vset.pattern.permute.xlu1 %v2506_v9 }
  0x49   : > { %260 = vperm.xlu1 %2175, %v2581_v4  }
  0x4b   : > { %308 = vperm.xlu0 %2178, %v2578_v3  }
  0x4d   : > { %264 = vperm.xlu1 %2175, %v2570_v1  }
  0x4f   : > { %2181 = vset.pattern.permute.xlu0 %v2509_v12 }
  0x50   : > { %320 = vperm.xlu0 %2181, %v2581_v4  }
  0x51   : > { %2176 = vset.pattern.permute.xlu1 %v2507_v10 }
  0x52   : > { %276 = vperm.xlu1 %2176, %v2573_v2  }
  0x54   : > { %2182 = vset.pattern.permute.xlu0 %v2510_v13 }
  0x55   : > { %336 = vperm.xlu0 %2182, %v2573_v2  }
  0x56   : > { %284 = vperm.xlu1 %2176, %v2570_v1  }
  0x59   : > { %348 = vperm.xlu0 %2182, %v2578_v3  }
  0x5a   : > { %288 = vperm.xlu1 %2176, %v2578_v3  }
  0x5d   : > { %2185 = vset.pattern.permute.xlu0 %v2511_v14 }
  0x5e   : > { %2179 = vset.pattern.permute.xlu1 %v2508_v11  ;;  %360 = vperm.xlu0 %2185, %v2581_v4  }
  0x5f   : > { %300 = vperm.xlu1 %2179, %v2581_v4  }
  0x62   : > { %2186 = vset.pattern.permute.xlu0 %v2512_v15 }
  0x63   : > { %304 = vperm.xlu1 %2179, %v2570_v1   ;;  %376 = vperm.xlu0 %2186, %v2573_v2  }
  0x67   : > { %2180 = vset.pattern.permute.xlu1 %v2509_v12  ;;  %388 = vperm.xlu0 %2186, %v2578_v3  }
  0x68   : > { %316 = vperm.xlu1 %2180, %v2573_v2  }
  0x6b   : > { %2189 = vset.pattern.permute.xlu0 %v2513_v16 }
  0x6c   : > { %324 = vperm.xlu1 %2180, %v2570_v1   ;;  %400 = vperm.xlu0 %2189, %v2581_v4  }
  0x70   : > { %328 = vperm.xlu1 %2180, %v2578_v3   ;;  %2190 = vset.pattern.permute.xlu0 %v2514_v17 }
  0x71   : > { %416 = vperm.xlu0 %2190, %v2573_v2  }
  0x74   : > { %2183 = vset.pattern.permute.xlu1 %v2510_v13 }
  0x75   : > { %340 = vperm.xlu1 %2183, %v2581_v4   ;;  %428 = vperm.xlu0 %2190, %v2578_v3  }
  0x79   : > { %344 = vperm.xlu1 %2183, %v2570_v1   ;;  %2193 = vset.pattern.permute.xlu0 %v2515_v18 }
  0x7a   : > { %440 = vperm.xlu0 %2193, %v2581_v4  }
  0x7d   : > { %2184 = vset.pattern.permute.xlu1 %v2511_v14 }
  0x7e   : > { %356 = vperm.xlu1 %2184, %v2573_v2   ;;  %2194 = vset.pattern.permute.xlu0 %v2516_v19 }
  0x7f   : > { %456 = vperm.xlu0 %2194, %v2573_v2  }
  0x82   : > { %364 = vperm.xlu1 %2184, %v2570_v1  }
  0x83   : > { %468 = vperm.xlu0 %2194, %v2578_v3  }
  0x86   : > { %368 = vperm.xlu1 %2184, %v2578_v3  }
  0x87   : > { %2197 = vset.pattern.permute.xlu0 %v2517_v20 }
  0x88   : > { %480 = vperm.xlu0 %2197, %v2581_v4  }
  0x8a   : > { %2187 = vset.pattern.permute.xlu1 %v2512_v15 }
  0x8b   : > { %380 = vperm.xlu1 %2187, %v2581_v4  }
  0x8c   : > { %2198 = vset.pattern.permute.xlu0 %v2518_v21 }
  0x8d   : > { %496 = vperm.xlu0 %2198, %v2573_v2  }
  0x8f   : > { %384 = vperm.xlu1 %2187, %v2570_v1  }
  0x91   : > { %508 = vperm.xlu0 %2198, %v2578_v3  }
  0x93   : > { %v2640_v22 = vpop.permute.xlu1 %163  ;;  %2188 = vset.pattern.permute.xlu1 %v2513_v16  ;;  %v2642_v23 = vpop.permute.xlu0 %153 }
  0x94   : > { %3804 = vst [vmem:[#allocation2_spill] sm:$0xff] %v2640_v22  ;;  %396 = vperm.xlu1 %2188, %v2573_v2   ;;  %v3823_v22 = vmov 31  }
  0x95   : > { %2201 = vset.pattern.permute.xlu0 %v2519_v24 }
  0x96   : > { %520 = vperm.xlu0 %2201, %v2581_v4  }
  0x97   : > { %v2647_v25 = vpop.permute.xlu1 %168  ;;  %v2649_v26 = vpop.permute.xlu0 %158 }
  0x98   : > { %3805 = vst [vmem:[#allocation3_spill] sm:$0xff] %v2647_v25  ;;  %3806 = vst [vmem:[#allocation4_spill] sm:$0xff] %v2649_v26  ;;  %404 = vperm.xlu1 %2188, %v2570_v1   ;;  %v3822_v25 = vmov 26  }
  0x9a   : > { %2202 = vset.pattern.permute.xlu0 %v2520_v27 }
  0x9b   : > { %536 = vperm.xlu0 %2202, %v2573_v2  }
  0x9c   : > { %v2654_v28 = vpop.permute.xlu1 %180  ;;  %408 = vperm.xlu1 %2188, %v2578_v3   ;;  %v2657_v29 = vpop.permute.xlu0 %176 }
  0x9d   : > { %v191_v63 = vmul.f32 %v2657_v29, %v2573_v2  ;;  %v192_v26 = vmul.f32 %v2654_v28, %v2581_v4 }
  0x9f   : > { %548 = vperm.xlu0 %2202, %v2578_v3  }
  0xa0   : > { %v2660_v30 = vpop.permute.xlu1 %184  ;;  %2191 = vset.pattern.permute.xlu1 %v2514_v17  ;;  %v2662_v31 = vpop.permute.xlu0 %188 }
  0xa1   : > { %420 = vperm.xlu1 %2191, %v2581_v4  }
  0xa3   : > { %2205 = vset.pattern.permute.xlu0 %v2521_v32 }
  0xa4   : > { %560 = vperm.xlu0 %2205, %v2581_v4  }
  0xa5   : > { %424 = vperm.xlu1 %2191, %v2570_v1   ;;  %v2668_v33 = vpop.permute.xlu1 %196  ;;  %v2670_v34 = vpop.permute.xlu0 %200 }
  0xa8   : > { %2209 = vset.pattern.permute.xlu0 %v3797_v35  ;;  %v3802_v35 = vmov 27  }
  0xa9   : > { %2192 = vset.pattern.permute.xlu1 %v2515_v18  ;;  %v2673_v36 = vpop.permute.xlu1 %204  ;;  %656 = vperm.xlu0 %2209, %v2573_v2  }
  0xaa   : > { %436 = vperm.xlu1 %2192, %v2573_v2   ;;  %v2677_v37 = vpop.permute.xlu0 %216 }
  0xab   : > { %v231_v8 = vmul.f32 %v2677_v37, %v2573_v2 }
  0xad   : > { %v2679_v38 = vpop.permute.xlu1 %208  ;;  %2212 = vset.pattern.permute.xlu0 %v3793_v39 }
  0xae   : > { %444 = vperm.xlu1 %2192, %v2570_v1   ;;  %776 = vperm.xlu0 %2212, %v2573_v2   ;;  %v2684_v40 = vpop.permute.xlu0 %228 }
  0xb2   : > { %448 = vperm.xlu1 %2192, %v2578_v3   ;;  %v2687_v41 = vpop.permute.xlu1 %220  ;;  %2215 = vset.pattern.permute.xlu0 %v3791_v42 }
  0xb3   : > { %620 = vperm.xlu0 %2215, %v2581_v4   ;;  %v2691_v43 = vpop.permute.xlu0 %240 }
  0xb4   : > { %3807 = vst [vmem:[#allocation5_spill] sm:$0xff] %v2691_v43 }
  0xb6   : > { %2195 = vset.pattern.permute.xlu1 %v2516_v19  ;;  %v2693_v44 = vpop.permute.xlu1 %224 }
  0xb7   : > { %460 = vperm.xlu1 %2195, %v2581_v4   ;;  %2218 = vset.pattern.permute.xlu0 %v3795_v45 }
  0xb8   : > { %760 = vperm.xlu0 %2218, %v2581_v4   ;;  %v257_v46 = vpop.permute.xlu0 %256 }
  0xb9   : > { %v271_v0 = vmul.f32 %v257_v46, %v2573_v2 }
  0xbb   : > { %464 = vperm.xlu1 %2195, %v2570_v1   ;;  %v2699_v47 = vpop.permute.xlu1 %236  ;;  %v2237_v9 = vpack.i.bf16 %v191_v63, %v271_v0 }
  0xbc   : > { %2219 = vset.pattern.permute.xlu0 %v2526_v48  ;;  %v2702_v49 = vpop.permute.xlu0 %268 }
  0xbd   : > { %576 = vperm.xlu0 %2219, %v2573_v2  }
  0xbf   : > { %2196 = vset.pattern.permute.xlu1 %v2517_v20  ;;  %v2706_v50 = vpop.permute.xlu1 %244 }
  0xc0   : > { %3808 = vst [vmem:[#allocation6_spill] sm:$0xff] %v2706_v50  ;;  %476 = vperm.xlu1 %2196, %v2573_v2  }
  0xc1   : > { %588 = vperm.xlu0 %2219, %v2578_v3   ;;  %v2710_v51 = vpop.permute.xlu0 %280 }
  0xc3   : > { %v2712_v52 = vpop.permute.xlu1 %248 }
  0xc4   : > { %3809 = vst [vmem:[#allocation7_spill] sm:$0xff] %v2712_v52  ;;  %484 = vperm.xlu1 %2196, %v2570_v1  }
  0xc5   : > { %2226 = vset.pattern.permute.xlu0 %v2527_v53 }
  0xc6   : > { %596 = vperm.xlu0 %2226, %v2573_v2   ;;  %v297_v54 = vpop.permute.xlu0 %296 }
  0xc7   : > { %v311_v10 = vmul.f32 %v297_v54, %v2573_v2 }
  0xc8   : > { %488 = vperm.xlu1 %2196, %v2578_v3   ;;  %v2718_v55 = vpop.permute.xlu1 %260 }
  0xc9   : > { %v2247_v13 = vpack.i.bf16 %v231_v8, %v311_v10 }
  0xca   : > { %604 = vperm.xlu0 %2226, %v2570_v1   ;;  %v2721_v56 = vpop.permute.xlu0 %308 }
  0xcc   : > { %2199 = vset.pattern.permute.xlu1 %v2518_v21  ;;  %v2724_v57 = vpop.permute.xlu1 %264 }
  0xcd   : > { %500 = vperm.xlu1 %2199, %v2581_v4  }
  0xce   : > { %608 = vperm.xlu0 %2226, %v2578_v3  }
  0xcf   : > { %v2728_v58 = vpop.permute.xlu0 %320 }
  0xd0   : > { %3810 = vst [vmem:[#allocation8_spill] sm:$0xff] %v2728_v58 }
  0xd1   : > { %504 = vperm.xlu1 %2199, %v2570_v1   ;;  %v2731_v59 = vpop.permute.xlu1 %276 }
  0xd2   : > { %2229 = vset.pattern.permute.xlu0 %v3799_v60 }
  0xd3   : > { %744 = vperm.xlu0 %2229, %v2570_v1  }
  0xd4   : > { %v2735_v61 = vpop.permute.xlu0 %336 }
  0xd5   : > { %2200 = vset.pattern.permute.xlu1 %v2519_v24  ;;  %v2738_v62 = vpop.permute.xlu1 %284 }
  0xd6   : > { %516 = vperm.xlu1 %2200, %v2573_v2  }
  0xd7   : > { %748 = vperm.xlu0 %2229, %v2578_v3  }
  0xd8   : > { %v2745_v5 = vpop.permute.xlu0 %348 }
  0xd9   : > { %v2747_v6 = vpop.permute.xlu1 %288 }
  0xda   : > { %524 = vperm.xlu1 %2200, %v2570_v1  }
  0xdb   : > { %2234 = vset.pattern.permute.xlu0 %v3800_v7 }
  0xdc   : > { %688 = vperm.xlu0 %2234, %v2578_v3  }
  0xdd   : > { %v2755_v11 = vpop.permute.xlu0 %360 }
  0xde   : > { %528 = vperm.xlu1 %2200, %v2578_v3   ;;  %v2758_v12 = vpop.permute.xlu1 %300 }
  0xe0   : > { %2238 = vrot.lane.b32.xlu0 %v2237_v9, %s2530_s16 }
  0xe1   : > { %2485 = vset.pattern.permute.xlu0 %v3793_v39 }
  0xe2   : > { %2203 = vset.pattern.permute.xlu1 %v2520_v27  ;;  %v2763_v14 = vpop.permute.xlu1 %304  ;;  %v2765_v15 = vpop.permute.xlu0 %376 }
  0xe3   : > { %540 = vperm.xlu1 %2203, %v2581_v4  }
  0xe4   : > { %2248 = vrot.lane.b32.xlu0 %v2247_v13, %s2531_s17 }
  0xe6   : > { %v2769_v16 = vpop.permute.xlu0 %388 }
  0xe7   : > { %544 = vperm.xlu1 %2203, %v2570_v1   ;;  %v2772_v17 = vpop.permute.xlu1 %316 }
  0xe8   : > { %3811 = vst [vmem:[#allocation9_spill] sm:$0xff] %v2772_v17 }
  0xeb   : > { %2204 = vset.pattern.permute.xlu1 %v2521_v32  ;;  %v2775_v18 = vpop.permute.xlu1 %324  ;;  %v2777_v19 = vpop.permute.xlu0 %400 }
  0xec   : > { %3812 = vst [vmem:[#allocation10_spill] sm:$0xff] %v2775_v18  ;;  %3813 = vst [vmem:[#allocation11_spill] sm:$0xff] %v2777_v19  ;;  %556 = vperm.xlu1 %2204, %v2573_v2  }
  0xef   : > { %v2780_v20 = vpop.permute.xlu1 %328 }
  0xf0   : > { %3814 = vst [vmem:[#allocation12_spill] sm:$0xff] %v2780_v20  ;;  %564 = vperm.xlu1 %2204, %v2570_v1   ;;  %v2783_v21 = vpop.permute.xlu0 %416  ;;  %v3819_v20 = vmov 29  }
  0xf4   : > { %568 = vperm.xlu1 %2204, %v2578_v3   ;;  %v2786_v24 = vpop.permute.xlu1 %340  ;;  %v2788_v27 = vpop.permute.xlu0 %428 }
  0xf8   : > { %2206 = vset.pattern.permute.xlu1 %v2526_v48  ;;  %v2791_v29 = vpop.permute.xlu1 %344 }
  0xf9   : > { %580 = vperm.xlu1 %2206, %v2581_v4   ;;  %v441_v32 = vpop.permute.xlu0 %440 }
  0xfa   : > { %v452_v28 = vmul.f32 %v441_v32, %v2581_v4 }
  0xfd   : > { %584 = vperm.xlu1 %2206, %v2570_v1   ;;  %v357_v37 = vpop.permute.xlu1 %356 }
  0xfe   : > { %v2795_v46 = vpop.permute.xlu0 %456  ;;  %v371_v19 = vmul.f32 %v357_v37, %v2573_v2  ;;  %v312_v37 = vmul.f32 %v2758_v12, %v2581_v4 }
 0x101   : > { %2207 = vset.pattern.permute.xlu1 %v3791_v42  ;;  %v2798_v54 = vpop.permute.xlu1 %364 }
 0x102   : > { %616 = vperm.xlu1 %2207, %v2573_v2   ;;  %v2801_v63 = vpop.permute.xlu0 %468 }
 0x105   : > { %v2803_v0 = vpop.permute.xlu1 %368 }
 0x106   : > { %2208 = vset.pattern.permute.xlu1 %v3799_v60 }
 0x107   : > { %736 = vperm.xlu1 %2208, %v2573_v2   ;;  %v2807_v48 = vpop.permute.xlu0 %480 }
 0x108   : > { %3815 = vst [vmem:[#allocation13_spill] sm:$0xff] %v2807_v48 }
 0x10a   : > { %v381_v8 = vpop.permute.xlu1 %380 }
 0x10b   : > { %2210 = vset.pattern.permute.xlu1 %v3795_v45  ;;  %v392_v32 = vmul.f32 %v381_v8, %v2581_v4 }
 0x10c   : > { %756 = vperm.xlu1 %2210, %v2573_v2   ;;  %v2811_v9 = vpop.permute.xlu0 %496 }
 0x10e   : > { %v2813_v10 = vpop.permute.xlu1 %384 }
 0x110   : > { %2211 = vset.pattern.permute.xlu1 %v3800_v7  ;;  %v2816_v13 = vpop.permute.xlu0 %508 }
 0x111   : > { %676 = vperm.xlu1 %2211, %v2573_v2  }
 0x113   : > { %v2819_v42 = vpop.permute.xlu1 %396 }
 0x114   : > { %3816 = vst [vmem:[#allocation14_spill] sm:$0xff] %v2819_v42 }
 0x115   : > { %2213 = vset.pattern.permute.xlu1 %v2527_v53  ;;  %v2822_v39 = vpop.permute.xlu0 %520 }
 0x116   : > { %600 = vperm.xlu1 %2213, %v2581_v4  }
 0x117   : > { %v2825_v45 = vpop.permute.xlu1 %404 }
 0x118   : > { %3817 = vst [vmem:[#allocation15_spill] sm:$0xff] %v2825_v45  ;;  %v3821_v45 = vmov 25  }
 0x11a   : > { %2214 = vset.pattern.permute.xlu1 %v3802_v35  ;;  %v2828_v60 = vpop.permute.xlu0 %536 }
 0x11b   : > { %696 = vperm.xlu1 %2214, %v2573_v2   ;;  %v2831_v7 = vpop.permute.xlu1 %408 }
 0x11c   : > { %3818 = vst [vmem:[#allocation16_spill] sm:$0xff] %v2831_v7 }
 0x11e   : > { %v2833_v48 = vpop.permute.xlu0 %548 }
 0x11f   : > { %2216 = vset.pattern.permute.xlu1 %v3819_v20 }
 0x120   : > { %740 = vperm.xlu1 %2216, %v2581_v4   ;;  %v2837_v53 = vpop.permute.xlu1 %420 }
 0x123   : > { %v2839_v18 = vpop.permute.xlu0 %560 }
 0x124   : > { %3820 = vst [vmem:[#allocation17_spill] sm:$0xff] %v2839_v18  ;;  %2217 = vset.pattern.permute.xlu1 %v3821_v45  ;;  %v2842_v52 = vpop.permute.xlu1 %424  ;;  %v272_v18 = vmul.f32 %v2718_v55, %v2581_v4  ;;  %v232_v55 = vmul.f32 %v2687_v41, %v2581_v4 }
 0x125   : > { %660 = vperm.xlu1 %2217, %v2581_v4  }
 0x128   : > { %v2845_v35 = vpop.permute.xlu0 %656 }
 0x129   : > { %2220 = vset.pattern.permute.xlu1 %v3822_v25  ;;  %v437_v7 = vpop.permute.xlu1 %436 }
 0x12a   : > { %v451_v20 = vmul.f32 %v437_v7, %v2573_v2  ;;  %680 = vperm.xlu1 %2220, %v2581_v4   ;;  %v2267_v7 = vpack.i.bf16 %v192_v26, %v272_v18  ;;  %v2277_v26 = vpack.i.bf16 %v232_v55, %v312_v37  ;;  %v293_v37 = vmul.f32 %v2738_v62, %v2570_v1 }
 0x12b   : > { %v313_v62 = vmul.f32 %v2763_v14, %v2570_v1 }
 0x12c   : > { %v2257_v58 = vpack.i.bf16 %v371_v19, %v451_v20  ;;  %v372_v19 = vmul.f32 %v2755_v11, %v2581_v4  ;;  %v3825_v11 = vmov 23  }
 0x12d   : > { %v445_v50 = vpop.permute.xlu1 %444  ;;  %v2853_v43 = vpop.permute.xlu0 %776 }
 0x12e   : > { %2221 = vset.pattern.permute.xlu1 %v3823_v22  ;;  %2258 = vrot.lane.b32.xlu0 %v2257_v58, %s2533_s18  ;;  %v3824_v58 = vmov 27   ;;  %v2287_v12 = vpack.i.bf16 %v372_v19, %v452_v28  ;;  %v213_v28 = vmul.f32 %v2673_v36, %v2570_v1  ;;  %v233_v36 = vmul.f32 %v2693_v44, %v2570_v1 }
 0x12f   : > { %780 = vperm.xlu1 %2221, %v2581_v4   ;;  %v453_v14 = vmul.f32 %v445_v50, %v2570_v1  ;;  %v294_v50 = vmul.f32 %v2747_v6, %v2578_v3 }
 0x131   : > { %v2862_v42 = vpop.permute.xlu1 %448 }
 0x132   : > { %2268 = vrot.lane.b32.xlu0 %v2267_v7, %s2530_s16  ;;  %v2870_v20 = vpop.permute.xlu0 %620 }
 0x133   : > { %2222 = vset.pattern.permute.xlu1 %v3824_v58 }
 0x134   : > { %700 = vperm.xlu1 %2222, %v2581_v4  }
 0x136   : > { %v461_v18 = vpop.permute.xlu1 %460  ;;  %2278 = vrot.lane.b32.xlu0 %v2277_v26, %s2531_s17  ;;  %v2303_v26 = vpack.i.bf16 %v213_v28, %v293_v37  ;;  %v2309_v37 = vpack.i.bf16 %v233_v36, %v313_v62  ;;  %v314_v36 = vmul.f32 %v2721_v56, %v2578_v3  ;;  %v1278_v56 = vld [vmem:[%s3789_s1] sm:$0xff] }
 0x137   : > { %v2875_v17 = vpop.permute.xlu0 %760  ;;  %v472_v41 = vmul.f32 %v461_v18, %v2581_v4  ;;  %v2891_v4 = vmul.f32 %v2816_v13, %v2578_v3 }
 0x138   : > { %2223 = vset.pattern.permute.xlu1 %v3825_v11 }
 0x139   : > { %624 = vperm.xlu1 %2223, %v2570_v1   ;;  %v2297_v55 = vpack.i.bf16 %v392_v32, %v472_v41  ;;  %v3826_v41 = vmov 30  }
 0x13a   : > { %v465_v7 = vpop.permute.xlu1 %464  ;;  %2288 = vrot.lane.b32.xlu0 %v2287_v12, %s2533_s18 }
 0x13c   : > { %v577_v19 = vpop.permute.xlu0 %576 }
 0x13d   : > { %2224 = vset.pattern.permute.xlu1 %v3821_v45 }
 0x13e   : > { %664 = vperm.xlu1 %2224, %v2570_v1   ;;  %2298 = vrot.lane.b32.xlu0 %v2297_v55, %s2531_s17  ;;  %v373_v55 = vmul.f32 %v2798_v54, %v2570_v1 }
 0x13f   : > { %v2893_v8 = vpop.permute.xlu1 %476 }
 0x140   : > { %v589_v12 = vpop.permute.xlu0 %588  ;;  %v2319_v28 = vpack.i.bf16 %v373_v55, %v453_v14  ;;  %v1279_v14 = vld [vmem:[%s3789_s1 + $0x8] sm:$0xff] }
 0x141   : > { %v2898_v18 = vmul.f32 %v589_v12, %v2578_v3  ;;  %v393_v12 = vmul.f32 %v2813_v10, %v2570_v1  ;;  %v234_v10 = vmul.f32 %v2684_v40, %v2578_v3  ;;  %v1995_v55 = vpack.c.bf16 %v1279_v14, %v1278_v56  ;;  %v1299_v56 = vld [vmem:[%s3789_s1 + $0xa8] sm:$0xff]  ;;  %v1310_v14 = vld [vmem:[%s3789_s1 + $0x100] sm:$0xff] }
 0x142   : > { %2225 = vset.pattern.permute.xlu1 %v3826_v41  ;;  %2304 = vrot.lane.b32.xlu0 %v2303_v26, %s2533_s18  ;;  %v473_v26 = vmul.f32 %v465_v7, %v2570_v1 }
 0x143   : > { %764 = vperm.xlu1 %2225, %v2570_v1   ;;  %v2905_v13 = vpop.permute.xlu1 %484  ;;  %v2450_v32 = vpack.i.bf16 %v2891_v4, %v2898_v18 }
 0x144   : > { %v2329_v54 = vpack.i.bf16 %v393_v12, %v473_v26  ;;  %v454_v26 = vmul.f32 %v2862_v42, %v2578_v3 }
 0x146   : > { %2310 = vrot.lane.b32.xlu0 %v2309_v37, %s2531_s17  ;;  %v1294_v37 = vld [vmem:[%s3789_s1 + $0x80] sm:$0xff] }
 0x147   : > { %2227 = vset.pattern.permute.xlu1 %v3822_v25  ;;  %v2914_v44 = vpop.permute.xlu1 %488  ;;  %v214_v25 = vmul.f32 %v2679_v38, %v2578_v3  ;;  %v1295_v38 = vld [vmem:[%s3789_s1 + $0x88] sm:$0xff] }
 0x148   : > { %684 = vperm.xlu1 %2227, %v2570_v1   ;;  %v1993_v40 = vpack.c.bf16 %v1295_v38, %v1294_v37 }
 0x149   : > { %v2335_v7 = vpack.i.bf16 %v214_v25, %v294_v50  ;;  %v1296_v50 = vld [vmem:[%s3789_s1 + $0x90] sm:$0xff]  ;;  %v511_v25 = vmul.f32 %v2811_v9, %v2573_v2  ;;  %v1326_v9 = vld [vmem:[%s3789_s1 + $0x180] sm:$0xff] }
 0x14a   : > { %2320 = vrot.lane.b32.xlu0 %v2319_v28, %s2533_s18  ;;  %v2341_v28 = vpack.i.bf16 %v234_v10, %v314_v36  ;;  %1994 = vmatprep.subr.bf16.mxu0 %v1993_v40  ;;  %v591_v10 = vmul.f32 %v577_v19, %v2573_v2  ;;  %v1298_v40 = vld [vmem:[%s3789_s1 + $0xa0] sm:$0xff] }
 0x14b   : > { %1996 = vmatpush3.bf16.msra.mxu0 %v1995_v55 }
 0x14c   : > { %2228 = vset.pattern.permute.xlu1 %v3823_v22  ;;  %v2924_v62 = vpop.permute.xlu1 %500  ;;  %v2361_v55 = vpack.i.bf16 %v511_v25, %v591_v10 }
 0x14d   : > { %784 = vperm.xlu1 %2228, %v2570_v1  }
 0x14e   : > { %2330 = vrot.lane.b32.xlu0 %v2329_v54, %s2531_s17  ;;  %v1297_v54 = vld [vmem:[%s3789_s1 + $0x98] sm:$0xff] }
 0x14f   : > { %v1997_v42 = vpack.c.bf16 %v1297_v54, %v1296_v50  ;;  %v1283_v50 = vld [vmem:[%s3789_s1 + $0x28] sm:$0xff]  ;;  %v597_v54 = vpop.permute.xlu0 %596 }
 0x150   : > { %v2934_v6 = vpop.permute.xlu1 %504 }
 0x151   : > { %2230 = vset.pattern.permute.xlu1 %v3824_v58  ;;  %1998 = vmatprep.subr.bf16.mxu0 %v1997_v42  ;;  %v611_v42 = vmul.f32 %v597_v54, %v2573_v2 }
 0x152   : > { %704 = vperm.xlu1 %2230, %v2570_v1   ;;  %2336 = vrot.lane.b32.xlu0 %v2335_v7, %s2533_s18  ;;  %v374_v1 = vmul.f32 %v2803_v0, %v2578_v3  ;;  %v1280_v0 = vld [vmem:[%s3789_s1 + $0x10] sm:$0xff]  ;;  %v1281_v7 = vld [vmem:[%s3789_s1 + $0x18] sm:$0xff] }
 0x153   : > { %v1999_v36 = vpack.c.bf16 %v1281_v7, %v1280_v0  ;;  %v1328_v7 = vld [vmem:[%s3789_s1 + $0x190] sm:$0xff] }
 0x154   : > { %v2351_v37 = vpack.i.bf16 %v374_v1, %v454_v26  ;;  %v1311_v26 = vld [vmem:[%s3789_s1 + $0x108] sm:$0xff]  ;;  %v1282_v1 = vld [vmem:[%s3789_s1 + $0x20] sm:$0xff] }
 0x155   : > { %v517_v12 = vpop.permute.xlu1 %516  ;;  %2000 = vmatpush3.bf16.msra.mxu0 %v1999_v36  ;;  %v2027_v25 = vpack.c.bf16 %v1311_v26, %v1310_v14  ;;  %v2003_v10 = vpack.c.bf16 %v1283_v50, %v1282_v1  ;;  %v1329_v36 = vld [vmem:[%s3789_s1 + $0x198] sm:$0xff]  ;;  %v1331_v50 = vld [vmem:[%s3789_s1 + $0x1a8] sm:$0xff] }
 0x156   : > { %2231 = vset.pattern.permute.xlu1 %v3825_v11  ;;  %2342 = vrot.lane.b32.xlu0 %v2341_v28, %s2531_s17  ;;  %v1327_v11 = vld [vmem:[%s3789_s1 + $0x188] sm:$0xff]  ;;  %v2001_v28 = vpack.c.bf16 %v1299_v56, %v1298_v40  ;;  %v531_v0 = vmul.f32 %v517_v12, %v2573_v2  ;;  %v1300_v12 = vld [vmem:[%s3789_s1 + $0xb0] sm:$0xff]  ;;  %v1313_v40 = vld [vmem:[%s3789_s1 + $0x118] sm:$0xff] }
 0x157   : > { %628 = vperm.xlu1 %2231, %v2578_v3   ;;  %v2025_v38 = vpack.c.bf16 %v1327_v11, %v1326_v9  ;;  %v1301_v9 = vld [vmem:[%s3789_s1 + $0xb8] sm:$0xff]  ;;  %v1312_v11 = vld [vmem:[%s3789_s1 + $0x110] sm:$0xff] }
 0x158   : > { %2002 = vmatprep.subr.bf16.mxu0 %v2001_v28  ;;  %v1284_v56 = vld [vmem:[%s3789_s1 + $0x30] sm:$0xff]  ;;  %v1285_v14 = vld [vmem:[%s3789_s1 + $0x38] sm:$0xff]  ;;  %v2031_v28 = vpack.c.bf16 %v1313_v40, %v1312_v11  ;;  %v2367_v1 = vpack.i.bf16 %v531_v0, %v611_v42 }
 0x159   : > { %v2979_v19 = vpop.permute.xlu1 %524  ;;  %2026 = vmatprep.subr.bf16.mxu1 %v2025_v38  ;;  %2004 = vmatpush3.bf16.msra.mxu0 %v2003_v10  ;;  %v2005_v38 = vpack.c.bf16 %v1301_v9, %v1300_v12  ;;  %v2007_v26 = vpack.c.bf16 %v1285_v14, %v1284_v56  ;;  %v1314_v10 = vld [vmem:[%s3789_s1 + $0x120] sm:$0xff]  ;;  %v1332_v11 = vld [vmem:[%s3789_s1 + $0x1b0] sm:$0xff]  ;;  %v1305_v14 = vld [vmem:[%s3789_s1 + $0xd8] sm:$0xff] }
 0x15a   : > { %2352 = vrot.lane.b32.xlu0 %v2351_v37, %s2533_s18  ;;  %2028 = vmatpush3.bf16.msra.mxu1 %v2027_v25  ;;  %v1302_v25 = vld [vmem:[%s3789_s1 + $0xc0] sm:$0xff]  ;;  %v1304_v56 = vld [vmem:[%s3789_s1 + $0xd0] sm:$0xff] }
 0x15b   : > { %2232 = vset.pattern.permute.xlu1 %v3821_v45  ;;  %v2029_v45 = vpack.c.bf16 %v1329_v36, %v1328_v7  ;;  %2006 = vmatprep.subr.bf16.mxu0 %v2005_v38  ;;  %v1315_v7 = vld [vmem:[%s3789_s1 + $0x128] sm:$0xff]  ;;  %v1286_v36 = vld [vmem:[%s3789_s1 + $0x40] sm:$0xff]  ;;  %v1333_v38 = vld [vmem:[%s3789_s1 + $0x1b8] sm:$0xff] }
 0x15c   : > { %668 = vperm.xlu1 %2232, %v2578_v3   ;;  %v2035_v12 = vpack.c.bf16 %v1315_v7, %v1314_v10  ;;  %v2037_v40 = vpack.c.bf16 %v1333_v38, %v1332_v11  ;;  %v1334_v10 = vld [vmem:[%s3789_s1 + $0x1c0] sm:$0xff]  ;;  %v1319_v11 = vld [vmem:[%s3789_s1 + $0x148] sm:$0xff] }
 0x15d   : > { %v3010_v37 = vpop.permute.xlu1 %528  ;;  %2030 = vmatprep.subr.bf16.mxu1 %v2029_v45  ;;  %2008 = vmatpush3.bf16.msra.mxu0 %v2007_v26  ;;  %v1287_v45 = vld [vmem:[%s3789_s1 + $0x48] sm:$0xff]  ;;  %v1290_v38 = vld [vmem:[%s3789_s1 + $0x60] sm:$0xff] }
 0x15e   : > { %2362 = vrot.lane.b32.xlu0 %v2361_v55, %s2530_s16  ;;  %v1330_v55 = vld [vmem:[%s3789_s1 + $0x1a0] sm:$0xff]  ;;  %2032 = vmatpush3.bf16.msra.mxu1 %v2031_v28  ;;  %v2011_v9 = vpack.c.bf16 %v1287_v45, %v1286_v36  ;;  %v1316_v28 = vld [vmem:[%s3789_s1 + $0x130] sm:$0xff]  ;;  %v1307_v45 = vld [vmem:[%s3789_s1 + $0xe8] sm:$0xff] }
 0x15f   : > { %v2033_v54 = vpack.c.bf16 %v1331_v50, %v1330_v55  ;;  %v1288_v55 = vld [vmem:[%s3789_s1 + $0x50] sm:$0xff]  ;;  %v1289_v50 = vld [vmem:[%s3789_s1 + $0x58] sm:$0xff]  ;;  %v1306_v36 = vld [vmem:[%s3789_s1 + $0xe0] sm:$0xff] }
 0x160   : > { %2233 = vset.pattern.permute.xlu1 %v3826_v41  ;;  %v1303_v41 = vld [vmem:[%s3789_s1 + $0xc8] sm:$0xff] }
 0x161   : > { %768 = vperm.xlu1 %2233, %v2578_v3   ;;  %v2009_v0 = vpack.c.bf16 %v1303_v41, %v1302_v25  ;;  %2034 = vmatprep.subr.bf16.mxu1 %v2033_v54  ;;  %v2015_v25 = vpack.c.bf16 %v1289_v50, %v1288_v55  ;;  %v291_v41 = vmul.f32 %v2731_v59, %v2573_v2  ;;  %v1318_v59 = vld [vmem:[%s3789_s1 + $0x140] sm:$0xff]  ;;  %v1308_v50 = vld [vmem:[%s3789_s1 + $0xf0] sm:$0xff] }
 0x162   : > { %v3048_v42 = vpop.permute.xlu1 %540  ;;  %2368 = vrot.lane.b32.xlu0 %v2367_v1, %s2533_s18  ;;  %2036 = vmatpush3.bf16.msra.mxu1 %v2035_v12  ;;  %v1317_v1 = vld [vmem:[%s3789_s1 + $0x138] sm:$0xff]  ;;  %v211_v12 = vmul.f32 %v2668_v33, %v2573_v2  ;;  %v2043_v33 = vpack.c.bf16 %v1319_v11, %v1318_v59  ;;  %v1338_v59 = vld [vmem:[%s3789_s1 + $0x1e0] sm:$0xff] }
 0x163   : > { %2010 = vmatprep.subr.bf16.mxu0 %v2009_v0  ;;  %2038 = vmatprep.subr.bf16.mxu1 %v2037_v40  ;;  %v2039_v54 = vpack.c.bf16 %v1317_v1, %v1316_v28  ;;  %v1335_v0 = vld [vmem:[%s3789_s1 + $0x1c8] sm:$0xff]  ;;  %v1336_v28 = vld [vmem:[%s3789_s1 + $0x1d0] sm:$0xff]  ;;  %v351_v1 = vmul.f32 %v2735_v61, %v2573_v2  ;;  %v1321_v61 = vld [vmem:[%s3789_s1 + $0x158] sm:$0xff] }
 0x164   : > { %2012 = vmatpush3.bf16.msra.mxu0 %v2011_v9  ;;  %v2041_v7 = vpack.c.bf16 %v1335_v0, %v1334_v10  ;;  %v2017_v9 = vpack.c.bf16 %v1307_v45, %v1306_v36  ;;  %v1291_v40 = vld [vmem:[%s3789_s1 + $0x68] sm:$0xff]  ;;  %v1293_v10 = vld [vmem:[%s3789_s1 + $0x78] sm:$0xff]  ;;  %v2534_v45 = vmov 28  }
 0x165   : > { %2235 = vset.pattern.permute.xlu1 %v3823_v22  ;;  %v2013_v22 = vpack.c.bf16 %v1305_v14, %v1304_v56  ;;  %v2242_v14 = vpack.i.bf16 %v211_v12, %v291_v41  ;;  %v1339_v12 = vld [vmem:[%s3789_s1 + $0x1e8] sm:$0xff] }
 0x166   : > { %788 = vperm.xlu1 %2235, %v2578_v3   ;;  %v3077_v26 = vpop.permute.xlu1 %544  ;;  %2040 = vmatpush3.bf16.msra.mxu1 %v2039_v54  ;;  %v1309_v54 = vld [vmem:[%s3789_s1 + $0xf8] sm:$0xff] }
 0x167   : > { %2014 = vmatprep.subr.bf16.mxu0 %v2013_v22  ;;  %2042 = vmatprep.subr.bf16.mxu1 %v2041_v7  ;;  %v1337_v22 = vld [vmem:[%s3789_s1 + $0x1d8] sm:$0xff]  ;;  %v2021_v41 = vpack.c.bf16 %v1309_v54, %v1308_v50  ;;  %v1324_v50 = vld [vmem:[%s3789_s1 + $0x170] sm:$0xff] }
 0x168   : > { %2016 = vmatpush3.bf16.msra.mxu0 %v2015_v25  ;;  %v2045_v55 = vpack.c.bf16 %v1337_v22, %v1336_v28  ;;  %v1320_v25 = vld [vmem:[%s3789_s1 + $0x150] sm:$0xff]  ;;  %v1325_v54 = vld [vmem:[%s3789_s1 + $0x178] sm:$0xff] }
 0x169   : > { %2018 = vmatprep.subr.bf16.mxu0 %v2017_v9  ;;  %v2047_v7 = vpack.c.bf16 %v1321_v61, %v1320_v25  ;;  %v391_v9 = vmul.f32 %v2765_v15, %v2573_v2  ;;  %v1341_v15 = vld [vmem:[%s3789_s1 + $0x1f8] sm:$0xff]  ;;  %v2055_v25 = vpack.c.bf16 %v1325_v54, %v1324_v50 }
 0x16a   : > { %2236 = vset.pattern.permute.xlu1 %v3824_v58  ;;  %v2019_v58 = vpack.c.bf16 %v1291_v40, %v1290_v38  ;;  %2044 = vmatpush3.bf16.msra.mxu1 %v2043_v33  ;;  %v471_v38 = vmul.f32 %v2795_v46, %v2573_v2  ;;  %v2049_v40 = vpack.c.bf16 %v1339_v12, %v1338_v59  ;;  %v1322_v33 = vld [vmem:[%s3789_s1 + $0x160] sm:$0xff]  ;;  %v3178_v46 = vld [vmem:[%s2567_s15 + $0x8] sm:$0xff]  ;;  %v3207_v59 = vld [vmem:[%s2567_s15 + $0x10] sm:$0xff] }
 0x16b   : > { %708 = vperm.xlu1 %2236, %v2578_v3   ;;  %v3118_v56 = vpop.permute.xlu1 %556  ;;  %v431_v3 = vmul.f32 %v2783_v21, %v2573_v2  ;;  %v1292_v21 = vld [vmem:[%s3789_s1 + $0x70] sm:$0xff]  ;;  %2046 = vmatprep.subr.bf16.mxu1 %v2045_v55  ;;  %v212_v22 = vmul.f32 %v3178_v46, %v2670_v34  ;;  %v352_v61 = vmul.f32 %v3178_v46, %v2786_v24 }
 0x16c   : > { %2020 = vmatpush3.bf16.msra.mxu0 %v2019_v58  ;;  %v2023_v36 = vpack.c.bf16 %v1293_v10, %v1292_v21  ;;  %v1323_v58 = vld [vmem:[%s3789_s1 + $0x168] sm:$0xff]  ;;  %v1340_v2 = vld [vmem:[%s3789_s1 + $0x1f0] sm:$0xff]  ;;  %v1358_v21 = vld [vmem:[%s3789_s1 + $0x280] sm:$0xff]  ;;  %v193_v24 = vmul.f32 %v3207_v59, %v2660_v30  ;;  %v433_v30 = vmul.f32 %v3207_v59, %v2842_v52 }
 0x16d   : > { %2022 = vmatprep.subr.bf16.mxu0 %v2021_v41  ;;  %v2252_v11 = vpack.i.bf16 %v351_v1, %v431_v3  ;;  %v292_v1 = vmul.f32 %v3178_v46, %v2710_v51  ;;  %v2262_v3 = vpack.i.bf16 %v391_v9, %v471_v38  ;;  %v2053_v55 = vpack.c.bf16 %v1341_v15, %v1340_v2  ;;  %v1359_v10 = vld [vmem:[%s3789_s1 + $0x288] sm:$0xff]  ;;  %v3215_v9 = vld [vmem:[%s2567_s15] sm:$0xff]  ;;  %v3230_v15 = vld [vmem:[%s2567_s15 + $0x18] sm:$0xff] }
 0x16e   : > { %2048 = vmatpush3.bf16.msra.mxu1 %v2047_v7  ;;  %v432_v41 = vmul.f32 %v3178_v46, %v2837_v53  ;;  %v273_v53 = vmul.f32 %v3207_v59, %v2724_v57  ;;  %v2535_v2 = vmov 24  }
 0x16f   : > { %2243 = vrot.lane.b32.xlu1 %v2242_v14, %s2533_s18  ;;  %v3149_v0 = vpop.permute.xlu1 %564  ;;  %v2051_v14 = vpack.c.bf16 %v1323_v58, %v1322_v33  ;;  %2050 = vmatprep.subr.bf16.mxu1 %v2049_v40  ;;  %v2272_v51 = vpack.i.bf16 %v212_v22, %v292_v1  ;;  %v194_v22 = vmul.f32 %v3230_v15, %v2662_v31  ;;  %v1390_v31 = vld [vmem:[%s3789_s1 + $0x380] sm:$0xff] }
 0x170   : > { %2302 = vset.pattern.permute.xlu1 %v2534_v45  ;;  %2024 = vmatpush3.bf16.msra.mxu0 %v2023_v36  ;;  %v2057_v36 = vpack.c.bf16 %v1359_v10, %v1358_v21  ;;  %v2282_v12 = vpack.i.bf16 %v352_v61, %v432_v41  ;;  %v2292_v38 = vpack.i.bf16 %v193_v24, %v273_v53 }
 0x171   : > { %v274_v1 = vmul.f32 %v3230_v15, %v2702_v49  ;;  %v1391_v49 = vld [vmem:[%s3789_s1 + $0x388] sm:$0xff]  ;;  %v791_v41 = vmul.f32 %v3215_v9, %v2853_v43  ;;  %v354_v21 = vmul.f32 %v3230_v15, %v2745_v5  ;;  %v434_v10 = vmul.f32 %v3230_v15, %v2788_v27 }
 0x172   : > { %2052 = vmatpush3.bf16.msra.mxu1 %v2051_v14  ;;  %2058 = vmatprep.subr.bf16.mxu0 %v2057_v36  ;;  %v3255_v36 = vpop.permute.xlu0 %604  ;;  %v394_v43 = vmul.f32 %v3230_v15, %v2769_v16  ;;  %v474_v5 = vmul.f32 %v3230_v15, %v2801_v63  ;;  %v532_v27 = vmul.f32 %v3178_v46, %v2822_v39 }
 0x173   : > { %v3168_v28 = vpop.permute.xlu1 %568  ;;  %2253 = vrot.lane.b32.xlu1 %v2252_v11, %s2530_s16  ;;  %2054 = vmatprep.subr.bf16.mxu1 %v2053_v55  ;;  %v551_v11 = vmul.f32 %v3215_v9, %v2828_v60  ;;  %v353_v60 = vmul.f32 %v3207_v59, %v2791_v29  ;;  %v2324_v29 = vpack.i.bf16 %v194_v22, %v274_v1 }
 0x174   : > { %v2356_v16 = vpack.i.bf16 %v394_v43, %v474_v5  ;;  %v671_v22 = vmul.f32 %v3215_v9, %v2845_v35  ;;  %v613_v5 = vmul.f32 %v3207_v59, %v3255_v36 }
 0x176   : > { %2056 = vmatpush3.bf16.msra.mxu1 %v2055_v25 }
 0x177   : > { %2263 = vrot.lane.b32.xlu1 %v2262_v3, %s2531_s17  ;;  %v2314_v3 = vpack.i.bf16 %v353_v60, %v433_v30 }
 0x178   : > { %v3191_v34 = vpop.permute.xlu1 %580 }
 0x17b   : > { %2273 = vrot.lane.b32.xlu1 %v2272_v51, %s2533_s18  ;;  %v2089_v51 = vpack.c.bf16 %v1391_v49, %v1390_v31 }
 0x17c   : > { %v3204_v7 = vpop.permute.xlu1 %584 }
 0x17d   : > { %2090 = vmatprep.subr.bf16.mxu1 %v2089_v51 }
 0x17f   : > { %2283 = vrot.lane.b32.xlu1 %v2282_v12, %s2530_s16 }
 0x181   : > { %v617_v40 = vpop.permute.xlu1 %616 }
 0x182   : > { %v631_v33 = vmul.f32 %v3215_v9, %v617_v40  ;;  %v632_v40 = vmul.f32 %v3178_v46, %v2870_v20  ;;  %v772_v20 = vmul.f32 %v3178_v46, %v2875_v17  ;;  %v592_v17 = vmul.f32 %v3178_v46, %v3191_v34 }
 0x183   : > { %2293 = vrot.lane.b32.xlu1 %v2292_v38, %s2530_s16 }
 0x184   : > { %v2373_v57 = vpack.i.bf16 %v551_v11, %v631_v33  ;;  %v2346_v11 = vpack.i.bf16 %v354_v21, %v434_v10  ;;  %v3270_v33 = vpop.permute.xlu0 %608 }
 0x186   : > { %v737_v58 = vpop.permute.xlu1 %736  ;;  %2374 = vrot.lane.b32.xlu0 %v2373_v57, %s2531_s17  ;;  %v552_v57 = vmul.f32 %v3178_v46, %v3048_v42 }
 0x187   : > { %716 = vperm.xlu1 %2302, %v3215_v9   ;;  %v751_v1 = vmul.f32 %v3215_v9, %v737_v58 }
 0x188   : > { %v2405_v63 = vpack.i.bf16 %v552_v57, %v632_v40 }
 0x18b   : > { %v757_v14 = vpop.permute.xlu1 %756  ;;  %2308 = vset.pattern.permute.xlu1 %v2535_v2 }
 0x18c   : > { %636 = vperm.xlu1 %2308, %v3215_v9   ;;  %v771_v52 = vmul.f32 %v3215_v9, %v757_v14  ;;  %v745_v14 = vpop.permute.xlu0 %744 }
 0x190   : > { %v677_v55 = vpop.permute.xlu1 %676  ;;  %2315 = vrot.lane.b32.xlu1 %v2314_v3, %s2530_s16 }
 0x191   : > { %v691_v50 = vmul.f32 %v3215_v9, %v677_v55  ;;  %2334 = vset.pattern.permute.xlu1 %v2534_v45  ;;  %v3286_v55 = vpop.permute.xlu0 %748 }
 0x193   : > { %v2383_v54 = vpack.i.bf16 %v691_v50, %v771_v52  ;;  %v2378_v50 = vpack.i.bf16 %v671_v22, %v751_v1 }
 0x194   : > { %2325 = vrot.lane.b32.xlu1 %v2324_v29, %s2530_s16  ;;  %v512_v29 = vmul.f32 %v3178_v46, %v2924_v62  ;;  %v553_v62 = vmul.f32 %v3207_v59, %v3077_v26  ;;  %v593_v26 = vmul.f32 %v3207_v59, %v3204_v7 }
 0x195   : > { %v601_v25 = vpop.permute.xlu1 %600  ;;  %2384 = vrot.lane.b32.xlu0 %v2383_v54, %s2533_s18  ;;  %v3296_v35 = vpop.permute.xlu0 %688 }
 0x196   : > { %v612_v12 = vmul.f32 %v3178_v46, %v601_v25  ;;  %v2388_v54 = vpack.i.bf16 %v512_v29, %v592_v17 }
 0x198   : > { %720 = vperm.xlu1 %2334, %v3178_v46   ;;  %v2399_v30 = vpack.i.bf16 %v532_v27, %v612_v12 }
 0x199   : > { %v3303_v51 = vpop.permute.xlu0 %2238 }
 0x19a   : > { %v697_v61 = vpop.permute.xlu1 %696 }
 0x19b   : > { %v711_v53 = vmul.f32 %v3215_v9, %v697_v61 }
 0x19c   : > { %2340 = vset.pattern.permute.xlu1 %v2535_v2 }
 0x19d   : > { %v2393_v24 = vpack.i.bf16 %v711_v53, %v791_v41  ;;  %640 = vperm.xlu1 %2340, %v3178_v46   ;;  %v3309_v61 = vpop.permute.xlu0 %2248 }
 0x19f   : > { %v741_v38 = vpop.permute.xlu1 %740  ;;  %2394 = vrot.lane.b32.xlu0 %v2393_v24, %s2531_s17 }
 0x1a0   : > { %v752_v53 = vmul.f32 %v3178_v46, %v741_v38 }
 0x1a1   : > { %2347 = vrot.lane.b32.xlu1 %v2346_v11, %s2530_s16  ;;  %v3318_v12 = vpop.permute.xlu0 %2258  ;;  %v513_v11 = vmul.f32 %v3207_v59, %v2934_v6  ;;  %v753_v6 = vmul.f32 %v3207_v59, %v745_v14  ;;  %v534_v14 = vmul.f32 %v3230_v15, %v3010_v37  ;;  %v554_v37 = vmul.f32 %v3230_v15, %v2833_v48 }
 0x1a2   : > { %2366 = vset.pattern.permute.xlu1 %v2534_v45 }
 0x1a3   : > { %2400 = vrot.lane.b32.xlu0 %v2399_v30, %s2533_s18  ;;  %v2420_v27 = vpack.i.bf16 %v513_v11, %v593_v26  ;;  %v171_v26 = vmul.f32 %v3215_v9, %v2642_v23  ;;  %v1342_v11 = vld [vmem:[%s3789_s1 + $0x200] sm:$0xff]  ;;  %v1360_v23 = vld [vmem:[%s3789_s1 + $0x290] sm:$0xff] }
 0x1a4   : > { %v661_v39 = vpop.permute.xlu1 %660 }
 0x1a5   : > { %2357 = vrot.lane.b32.xlu1 %v2356_v16, %s2531_s17  ;;  %v672_v21 = vmul.f32 %v3178_v46, %v661_v39  ;;  %v3327_v38 = vpop.permute.xlu0 %2268 }
 0x1a7   : > { %2406 = vrot.lane.b32.xlu0 %v2405_v63, %s2531_s17  ;;  %v2410_v24 = vpack.i.bf16 %v672_v21, %v752_v53  ;;  %v2241_v21 = vunpack.i.h.bf16 %v3303_v51 }
 0x1a9   : > { %v681_v60 = vpop.permute.xlu1 %680  ;;  %724 = vperm.xlu1 %2366, %v3207_v59  }
 0x1aa   : > { %v692_v42 = vmul.f32 %v3178_v46, %v681_v60 }
 0x1ac   : > { %v2415_v3 = vpack.i.bf16 %v692_v42, %v772_v20  ;;  %v614_v20 = vmul.f32 %v3230_v15, %v3270_v33 }
 0x1ad   : > { %2372 = vset.pattern.permute.xlu1 %v2535_v2 }
 0x1ae   : > { %v781_v52 = vpop.permute.xlu1 %780  ;;  %644 = vperm.xlu1 %2372, %v3207_v59   ;;  %2416 = vrot.lane.b32.xlu0 %v2415_v3, %s2533_s18 }
 0x1af   : > { %v792_v25 = vmul.f32 %v3178_v46, %v781_v52  ;;  %v2460_v52 = vpack.i.bf16 %v534_v14, %v614_v20 }
 0x1b2   : > { %2379 = vrot.lane.b32.xlu1 %v2378_v50, %s2530_s16 }
 0x1b3   : > { %v701_v58 = vpop.permute.xlu1 %700  ;;  %2398 = vset.pattern.permute.xlu1 %v2534_v45 }
 0x1b4   : > { %v712_v31 = vmul.f32 %v3178_v46, %v701_v58  ;;  %v754_v58 = vmul.f32 %v3230_v15, %v3286_v55 }
 0x1b6   : > { %v2425_v49 = vpack.i.bf16 %v712_v31, %v792_v25  ;;  %2389 = vrot.lane.b32.xlu1 %v2388_v54, %s2530_s16  ;;  %v694_v54 = vmul.f32 %v3230_v15, %v3296_v35 }
 0x1b8   : > { %v625_v34 = vpop.permute.xlu1 %624  ;;  %2426 = vrot.lane.b32.xlu0 %v2425_v49, %s2531_s17 }
 0x1b9   : > { %v633_v41 = vmul.f32 %v3207_v59, %v625_v34 }
 0x1ba   : > { %728 = vperm.xlu1 %2398, %v3230_v15  }
 0x1bb   : > { %v2435_v45 = vpack.i.bf16 %v553_v62, %v633_v41 }
 0x1bd   : > { %v665_v10 = vpop.permute.xlu1 %664  ;;  %2436 = vrot.lane.b32.xlu0 %v2435_v45, %s2531_s17 }
 0x1be   : > { %2404 = vset.pattern.permute.xlu1 %v2535_v2  ;;  %v533_v2 = vmul.f32 %v3207_v59, %v2979_v19  ;;  %v673_v16 = vmul.f32 %v3207_v59, %v665_v10  ;;  %v3336_v19 = vpop.permute.xlu0 %2278  ;;  %v2240_v10 = vunpack.i.l.bf16 %v3303_v51 }
 0x1bf   : > { %648 = vperm.xlu1 %2404, %v3230_v15  }
 0x1c0   : > { %v2430_v30 = vpack.i.bf16 %v533_v2, %v613_v5  ;;  %v2440_v63 = vpack.i.bf16 %v673_v16, %v753_v6  ;;  %v1343_v5 = vld [vmem:[%s3789_s1 + $0x208] sm:$0xff] }
 0x1c2   : > { %v765_v43 = vpop.permute.xlu1 %764  ;;  %v3345_v1 = vpop.permute.xlu0 %2288 }
 0x1c3   : > { %2411 = vrot.lane.b32.xlu1 %v2410_v24, %s2530_s16  ;;  %v773_v7 = vmul.f32 %v3207_v59, %v765_v43  ;;  %v251_v24 = vmul.f32 %v3215_v9, %v2699_v47  ;;  %v1361_v47 = vld [vmem:[%s3789_s1 + $0x298] sm:$0xff] }
 0x1c4   : > { %v2061_v14 = vpack.c.bf16 %v1361_v47, %v1360_v23  ;;  %v2270_v23 = vunpack.i.l.bf16 %v3327_v38 }
 0x1c6   : > { %v3356_v50 = vpop.permute.xlu0 %2298 }
 0x1c7   : > { %v685_v40 = vpop.permute.xlu1 %684  ;;  %2421 = vrot.lane.b32.xlu1 %v2420_v27, %s2530_s16  ;;  %v2251_v27 = vunpack.i.h.bf16 %v3309_v61 }
 0x1c8   : > { %v693_v57 = vmul.f32 %v3207_v59, %v685_v40  ;;  %v2250_v40 = vunpack.i.l.bf16 %v3309_v61  ;;  %v1344_v61 = vld [vmem:[%s3789_s1 + $0x210] sm:$0xff] }
 0x1ca   : > { %v2445_v39 = vpack.i.bf16 %v693_v57, %v773_v7  ;;  %v3364_v48 = vpop.permute.xlu0 %2304  ;;  %v1002_v7 = vsel %vm987_vm0, %v251_v24, %v2240_v10  ;;  %v988_v57 = vsel %vm987_vm0, %v171_v26, %v2241_v21  ;;  %v1393_v21 = vld [vmem:[%s3789_s1 + $0x398] sm:$0xff]  ;;  %v3829_v10 = vld [vmem:[#allocation2_spill] sm:$0xff] }
 0x1cb   : > { %2431 = vrot.lane.b32.xlu1 %v2430_v30, %s2533_s18 }
 0x1cc   : > { %v785_v36 = vpop.permute.xlu1 %784  ;;  %2446 = vrot.lane.b32.xlu0 %v2445_v39, %s2533_s18  ;;  %v2059_v39 = vpack.c.bf16 %v1343_v5, %v1342_v11  ;;  %v1365_v11 = vld [vmem:[%s3789_s1 + $0x2b8] sm:$0xff]  ;;  %v3457_v5 = vld [vmem:[%s3789_s1 + $0x230] sm:$0xff] }
 0x1cd   : > { %v793_v42 = vmul.f32 %v3207_v59, %v785_v36 }
 0x1ce   : > { %v3368_v34 = vpop.permute.xlu0 %2310 }
 0x1cf   : > { %2441 = vrot.lane.b32.xlu1 %v2440_v63, %s2530_s16 }
 0x1d1   : > { %v705_v60 = vpop.permute.xlu1 %704 }
 0x1d2   : > { %v713_v22 = vmul.f32 %v3207_v59, %v705_v60  ;;  %v3371_v41 = vpop.permute.xlu0 %2320  ;;  %v1345_v60 = vld [vmem:[%s3789_s1 + $0x218] sm:$0xff] }
 0x1d3   : > { %2451 = vrot.lane.b32.xlu1 %v2450_v32, %s2530_s16 }
 0x1d4   : > { %v2455_v3 = vpack.i.bf16 %v713_v22, %v793_v42  ;;  %v3827_v42 = vld [vmem:[#allocation9_spill] sm:$0xff] }
 0x1d5   : > { %v331_v22 = vmul.f32 %v3215_v9, %v3827_v42  ;;  %v1394_v42 = vld [vmem:[%s3789_s1 + $0x3a0] sm:$0xff] }
 0x1d6   : > { %v629_v17 = vpop.permute.xlu1 %628  ;;  %2456 = vrot.lane.b32.xlu0 %v2455_v3, %s2531_s17  ;;  %v3398_v6 = vpop.permute.xlu0 %2330  ;;  %v3828_v3 = vld [vmem:[#allocation14_spill] sm:$0xff] }
 0x1d7   : > { %v634_v33 = vmul.f32 %v3230_v15, %v629_v17  ;;  %2461 = vrot.lane.b32.xlu1 %v2460_v52, %s2533_s18  ;;  %v411_v52 = vmul.f32 %v3215_v9, %v3828_v3 }
 0x1d9   : > { %v2465_v29 = vpack.i.bf16 %v554_v37, %v634_v33  ;;  %v1362_v33 = vld [vmem:[%s3789_s1 + $0x2a0] sm:$0xff] }
 0x1db   : > { %v669_v4 = vpop.permute.xlu1 %668  ;;  %2466 = vrot.lane.b32.xlu0 %v2465_v29, %s2531_s17  ;;  %v1363_v29 = vld [vmem:[%s3789_s1 + $0x2a8] sm:$0xff] }
 0x1dc   : > { %v674_v18 = vmul.f32 %v3230_v15, %v669_v4  ;;  %v1375_v4 = vld [vmem:[%s3789_s1 + $0x308] sm:$0xff] }
 0x1de   : > { %v2470_v32 = vpack.i.bf16 %v674_v18, %v754_v58  ;;  %v1374_v58 = vld [vmem:[%s3789_s1 + $0x300] sm:$0xff] }
 0x1e0   : > { %v769_v25 = vpop.permute.xlu1 %768  ;;  %2471 = vrot.lane.b32.xlu1 %v2470_v32, %s2530_s16 }
 0x1e1   : > { %v774_v31 = vmul.f32 %v3230_v15, %v769_v25  ;;  %v1346_v25 = vld [vmem:[%s3789_s1 + $0x220] sm:$0xff] }
 0x1e3   : > { %v2475_v49 = vpack.i.bf16 %v694_v54, %v774_v31  ;;  %v2063_v54 = vpack.c.bf16 %v1345_v60, %v1344_v61  ;;  %v2261_v31 = vunpack.i.h.bf16 %v3318_v12 }
 0x1e5   : > { %v789_v55 = vpop.permute.xlu1 %788  ;;  %2476 = vrot.lane.b32.xlu0 %v2475_v49, %s2533_s18  ;;  %v2260_v49 = vunpack.i.l.bf16 %v3318_v12  ;;  %v3446_v12 = vpop.permute.xlu0 %2336  ;;  %s145_s18 = scalar_lea.vmem %s3790_s2, %s1812_s12 }
 0x1e6   : > { %v794_v45 = vmul.f32 %v3230_v15, %v789_v55 }
 0x1ea   : > { %v709_v62 = vpop.permute.xlu1 %708 }
 0x1eb   : > { %v714_v35 = vmul.f32 %v3230_v15, %v709_v62  ;;  %v2065_v62 = vpack.c.bf16 %v1363_v29, %v1362_v33  ;;  %v1367_v33 = vld [vmem:[%s3789_s1 + $0x2c8] sm:$0xff] }
 0x1ed   : > { %v2480_v53 = vpack.i.bf16 %v714_v35, %v794_v45  ;;  %v1347_v45 = vld [vmem:[%s3789_s1 + $0x228] sm:$0xff]  ;;  %v1392_v35 = vld [vmem:[%s3789_s1 + $0x390] sm:$0xff] }
 0x1ee   : > { %v2244_v43 = vpop.permute.xlu1 %2243 }
 0x1ef   : > { %v2246_v2 = vunpack.i.h.bf16 %v2244_v43  ;;  %v2245_v51 = vunpack.i.l.bf16 %v2244_v43  ;;  %2481 = vrot.lane.b32.xlu1 %v2480_v53, %s2531_s17  ;;  %v3444_v53 = vmul.f32 %v3207_v59, %v3829_v10  ;;  %v1364_v43 = vld [vmem:[%s3789_s1 + $0x2b0] sm:$0xff] }
 0x1f0   : > { %v2069_v60 = vpack.c.bf16 %v1365_v11, %v1364_v43  ;;  %v1368_v11 = vld [vmem:[%s3789_s1 + $0x2d0] sm:$0xff] }
 0x1f1   : > { %v1006_v30 = vsel %vm992_vm1, %v1002_v7, %v2245_v51  ;;  %v993_v16 = vsel %vm992_vm1, %v988_v57, %v2246_v2  ;;  %v2091_v2 = vpack.c.bf16 %v1375_v4, %v1374_v58  ;;  %v2271_v51 = vunpack.i.h.bf16 %v3327_v38  ;;  %v1376_v7 = vld [vmem:[%s3789_s1 + $0x310] sm:$0xff]  ;;  %v1377_v57 = vld [vmem:[%s3789_s1 + $0x318] sm:$0xff] }
 0x1f2   : > { %v2254_v36 = vpop.permute.xlu1 %2253  ;;  %v1010_v63 = vsel %vm997_vm2, %v1006_v30, %v2250_v40  ;;  %v998_v20 = vsel %vm997_vm2, %v993_v16, %v2251_v27  ;;  %v3466_v40 = vld [vmem:[%s3789_s1 + $0x238] sm:$0xff]  ;;  %v2067_v16 = vpack.c.bf16 %v1347_v45, %v1346_v25  ;;  %v2095_v29 = vpack.c.bf16 %v1377_v57, %v1376_v7  ;;  %v3503_v25 = vpop.permute.xlu0 %2342  ;;  %v1379_v45 = vld [vmem:[%s3789_s1 + $0x328] sm:$0xff]  ;;  %v1396_v7 = vld [vmem:[%s3789_s1 + $0x3b0] sm:$0xff] }
 0x1f3   : > { %v2256_v17 = vunpack.i.h.bf16 %v2254_v36  ;;  %v2255_v37 = vunpack.i.l.bf16 %v2254_v36  ;;  %1470 = vmatprep.mubr.f32.mxu0 %v1010_v63  ;;  %v3830_v36 = vld [vmem:[#allocation4_spill] sm:$0xff]  ;;  %v2281_v58 = vunpack.i.h.bf16 %v3336_v19  ;;  %v2280_v4 = vunpack.i.l.bf16 %v3336_v19  ;;  %v3510_v19 = vld [vmem:[%s3789_s1 + $0x248] sm:$0xff]  ;;  %v1397_v57 = vld [vmem:[%s3789_s1 + $0x3b8] sm:$0xff] }
 0x1f4   : > { %1471 = vmatmul.mubr.f32.vlgmr.msra.gmra.mrb[0].mxu0 %v998_v20  ;;  %v172_v63 = vmul.f32 %v3178_v46, %v3830_v36  ;;  %v3831_v20 = vld [vmem:[#allocation5_spill] sm:$0xff]  ;;  %v1380_v36 = vld [vmem:[%s3789_s1 + $0x330] sm:$0xff] }
 0x1f5   : > { %v1026_v18 = vsel %vm987_vm0, %v411_v52, %v2255_v37  ;;  %v1014_v32 = vsel %vm987_vm0, %v331_v22, %v2256_v17  ;;  %2060 = vmatpush3.bf16.msra.mxu0 %v2059_v39  ;;  %v2093_v39 = vpack.c.bf16 %v1393_v21, %v1392_v35  ;;  %v1395_v22 = vld [vmem:[%s3789_s1 + $0x3a8] sm:$0xff]  ;;  %v2071_v17 = vpack.c.bf16 %v3466_v40, %v3457_v5  ;;  %v1366_v37 = vld [vmem:[%s3789_s1 + $0x2c0] sm:$0xff]  ;;  %v3833_v5 = vld [vmem:[#allocation8_spill] sm:$0xff] }
 0x1f6   : > { %v2264_v55 = vpop.permute.xlu1 %2263  ;;  %2062 = vmatprep.subr.bf16.mxu0 %v2061_v14  ;;  %v1030_v47 = vsel %vm992_vm1, %v1026_v18, %v2260_v49  ;;  %v1018_v27 = vsel %vm992_vm1, %v1014_v32, %v2261_v31  ;;  %v252_v14 = vmul.f32 %v3178_v46, %v3831_v20  ;;  %v989_v32 = vsel %vm987_vm0, %v172_v63, %v2271_v51  ;;  %v3832_v35 = vld [vmem:[#allocation6_spill] sm:$0xff]  ;;  %v3834_v51 = vld [vmem:[#allocation11_spill] sm:$0xff]  ;;  %v1369_v40 = vld [vmem:[%s3789_s1 + $0x2d8] sm:$0xff] }
 0x1f7   : > { %v2266_v26 = vunpack.i.h.bf16 %v2264_v55  ;;  %v2265_v24 = vunpack.i.l.bf16 %v2264_v55  ;;  %v2097_v55 = vpack.c.bf16 %v1395_v22, %v1394_v42  ;;  %v253_v21 = vmul.f32 %v3207_v59, %v3832_v35  ;;  %v1399_v42 = vld [vmem:[%s3789_s1 + $0x3c8] sm:$0xff] }
 0x1f8   : > { %v1003_v18 = vsel %vm987_vm0, %v252_v14, %v2270_v23  ;;  %v2073_v43 = vpack.c.bf16 %v1367_v33, %v1366_v37  ;;  %v412_v23 = vmul.f32 %v3178_v46, %v3834_v51  ;;  %v2301_v63 = vunpack.i.h.bf16 %v3356_v50  ;;  %v3560_v37 = vpop.permute.xlu0 %2352 }
 0x1f9   : > { %v1034_v30 = vsel %vm997_vm2, %v1030_v47, %v2265_v24  ;;  %v1022_v38 = vsel %vm997_vm2, %v1018_v27, %v2266_v26  ;;  %2064 = vmatpush3.bf16.msra.mxu0 %v2063_v54  ;;  %v3501_v54 = vld [vmem:[%s3789_s1 + $0x240] sm:$0xff]  ;;  %v2300_v20 = vunpack.i.l.bf16 %v3356_v50  ;;  %v2312_v35 = vunpack.i.l.bf16 %v3368_v34 }
 0x1fa   : > { %v2274_v61 = vpop.permute.xlu1 %2273  ;;  %1555 = vmatprep.mubr.f32.mxu1 %v1034_v30  ;;  %2066 = vmatprep.subr.bf16.mxu0 %v2065_v62  ;;  %v1378_v62 = vld [vmem:[%s3789_s1 + $0x320] sm:$0xff]  ;;  %v2291_v30 = vunpack.i.h.bf16 %v3345_v1 }
 0x1fb   : > { %v2276_v3 = vunpack.i.h.bf16 %v2274_v61  ;;  %v2275_v52 = vunpack.i.l.bf16 %v2274_v61  ;;  %1556 = vmatmul.mubr.f32.vlgmr.msra.gmra.mrb[0].mxu1 %v1022_v38  ;;  %v2290_v38 = vunpack.i.l.bf16 %v3345_v1  ;;  %v1381_v1 = vld [vmem:[%s3789_s1 + $0x338] sm:$0xff] }
 0x1fc   : > { %2092 = vmatpush3.bf16.msra.mxu1 %v2091_v2  ;;  %v332_v2 = vmul.f32 %v3178_v46, %v3833_v5  ;;  %v1401_v5 = vld [vmem:[%s3789_s1 + $0x3d8] sm:$0xff] }
 0x1fd   : > { %v1007_v31 = vsel %vm992_vm1, %v1003_v18, %v2275_v52  ;;  %v994_v49 = vsel %vm992_vm1, %v989_v32, %v2276_v3  ;;  %2068 = vmatpush3.bf16.msra.mxu0 %v2067_v16  ;;  %2094 = vmatprep.subr.bf16.mxu1 %v2093_v39  ;;  %v2075_v16 = vpack.c.bf16 %v3510_v19, %v3501_v54  ;;  %v1352_v18 = vld [vmem:[%s3789_s1 + $0x250] sm:$0xff]  ;;  %v1353_v32 = vld [vmem:[%s3789_s1 + $0x258] sm:$0xff]  ;;  %v2307_v54 = vunpack.i.h.bf16 %v3364_v48  ;;  %v1371_v19 = vld [vmem:[%s3789_s1 + $0x2e8] sm:$0xff] }
 0x1fe   : > { %v2284_v10 = vpop.permute.xlu1 %2283  ;;  %v1011_v26 = vsel %vm997_vm2, %v1007_v31, %v2280_v4  ;;  %v999_v24 = vsel %vm997_vm2, %v994_v49, %v2281_v58  ;;  %2070 = vmatprep.subr.bf16.mxu0 %v2069_v60  ;;  %v2099_v39 = vpack.c.bf16 %v1379_v45, %v1378_v62  ;;  %v1398_v60 = vld [vmem:[%s3789_s1 + $0x3c0] sm:$0xff]  ;;  %v2077_v52 = vpack.c.bf16 %v1369_v40, %v1368_v11  ;;  %v1372_v40 = vld [vmem:[%s3789_s1 + $0x2f0] sm:$0xff] }
 0x1ff   : > { %v2286_v47 = vunpack.i.h.bf16 %v2284_v10  ;;  %v2285_v27 = vunpack.i.l.bf16 %v2284_v10  ;;  %1475 = vmatprep.mubr.f32.mxu0 %v1011_v26  ;;  %v2306_v31 = vunpack.i.l.bf16 %v3364_v48  ;;  %v1370_v49 = vld [vmem:[%s3789_s1 + $0x2e0] sm:$0xff]  ;;  %v2105_v62 = vpack.c.bf16 %v1399_v42, %v1398_v60  ;;  %v1357_v60 = vld [vmem:[%s3789_s1 + $0x278] sm:$0xff] }
 0x200   : > { %1476 = vmatmul.mubr.f32.gmra.mrb[2].mxu0 %v999_v24  ;;  %2096 = vmatpush3.bf16.msra.mxu1 %v2095_v29  ;;  %v2313_v45 = vunpack.i.h.bf16 %v3368_v34  ;;  %v1382_v26 = vld [vmem:[%s3789_s1 + $0x340] sm:$0xff]  ;;  %v1383_v24 = vld [vmem:[%s3789_s1 + $0x348] sm:$0xff] }
 0x201   : > { %v1027_v14 = vsel %vm987_vm0, %v412_v23, %v2285_v27  ;;  %v1015_v61 = vsel %vm987_vm0, %v332_v2, %v2286_v47  ;;  %2072 = vmatpush3.bf16.msra.mxu0 %v2071_v17  ;;  %2098 = vmatprep.subr.bf16.mxu1 %v2097_v55  ;;  %v2101_v17 = vpack.c.bf16 %v1397_v57, %v1396_v7  ;;  %v1354_v47 = vld [vmem:[%s3789_s1 + $0x260] sm:$0xff]  ;;  %v1355_v27 = vld [vmem:[%s3789_s1 + $0x268] sm:$0xff]  ;;  %v1373_v7 = vld [vmem:[%s3789_s1 + $0x2f8] sm:$0xff] }
 0x202   : > { %v2294_v22 = vpop.permute.xlu1 %2293  ;;  %v1031_v50 = vsel %vm992_vm1, %v1027_v14, %v2290_v38  ;;  %v1019_v3 = vsel %vm992_vm1, %v1015_v61, %v2291_v30  ;;  %2074 = vmatprep.subr.bf16.mxu0 %v2073_v43  ;;  %v2103_v55 = vpack.c.bf16 %v1381_v1, %v1380_v36  ;;  %v2081_v23 = vpack.c.bf16 %v1371_v19, %v1370_v49  ;;  %v3613_v30 = vpop.permute.xlu0 %2362  ;;  %v1356_v1 = vld [vmem:[%s3789_s1 + $0x270] sm:$0xff]  ;;  %v3838_v19 = vld [vmem:[#allocation15_spill] sm:$0xff] }
 0x203   : > { %v2296_v33 = vunpack.i.h.bf16 %v2294_v22  ;;  %v2295_v29 = vunpack.i.l.bf16 %v2294_v22  ;;  %v1035_v58 = vsel %vm997_vm2, %v1031_v50, %v2300_v20  ;;  %v1023_v4 = vsel %vm997_vm2, %v1019_v3, %v2301_v63  ;;  %v1402_v63 = vld [vmem:[%s3789_s1 + $0x3e0] sm:$0xff]  ;;  %v1403_v20 = vld [vmem:[%s3789_s1 + $0x3e8] sm:$0xff] }
 0x204   : > { %1560 = vmatprep.mubr.f32.mxu1 %v1035_v58  ;;  %2100 = vmatpush3.bf16.msra.mxu1 %v2099_v39  ;;  %v2107_v57 = vpack.c.bf16 %v1383_v24, %v1382_v26  ;;  %v1385_v39 = vld [vmem:[%s3789_s1 + $0x358] sm:$0xff]  ;;  %v2083_v36 = vpack.c.bf16 %v1355_v27, %v1354_v47  ;;  %v2085_v61 = vpack.c.bf16 %v1373_v7, %v1372_v40  ;;  %v1386_v50 = vld [vmem:[%s3789_s1 + $0x360] sm:$0xff]  ;;  %v1387_v3 = vld [vmem:[%s3789_s1 + $0x368] sm:$0xff]  ;;  %v2323_v24 = vunpack.i.h.bf16 %v3371_v41 }
 0x205   : > { %1561 = vmatmul.mubr.f32.gmra.mrb[2].mxu1 %v1023_v4  ;;  %v1004_v10 = vsel %vm987_vm0, %v253_v21, %v2295_v29  ;;  %v990_v48 = vsel %vm987_vm0, %v3444_v53, %v2296_v33  ;;  %2076 = vmatpush3.bf16.msra.mxu0 %v2075_v16  ;;  %v2079_v21 = vpack.c.bf16 %v1353_v32, %v1352_v18  ;;  %v1400_v53 = vld [vmem:[%s3789_s1 + $0x3d0] sm:$0xff]  ;;  %v1405_v33 = vld [vmem:[%s3789_s1 + $0x3f8] sm:$0xff]  ;;  %v3835_v29 = vld [vmem:[#allocation3_spill] sm:$0xff] }
 0x206   : > { %v3589_v43 = vpop.permute.xlu1 %716  ;;  %v1008_v11 = vsel %vm992_vm1, %v1004_v10, %v2306_v31  ;;  %v995_v34 = vsel %vm992_vm1, %v990_v48, %v2307_v54  ;;  %2078 = vmatprep.subr.bf16.mxu0 %v2077_v52  ;;  %2102 = vmatprep.subr.bf16.mxu1 %v2101_v17  ;;  %v2109_v38 = vpack.c.bf16 %v1401_v5, %v1400_v53  ;;  %v1384_v16 = vld [vmem:[%s3789_s1 + $0x350] sm:$0xff]  ;;  %v3836_v4 = vld [vmem:[#allocation7_spill] sm:$0xff]  ;;  %v3837_v32 = vld [vmem:[#allocation10_spill] sm:$0xff]  ;;  %v2369_v31 = vpop.permute.xlu0 %2368 }
 0x207   : > { %v1012_v2 = vsel %vm997_vm2, %v1008_v11, %v2312_v35  ;;  %v1000_v51 = vsel %vm997_vm2, %v995_v34, %v2313_v45  ;;  %v2111_v42 = vpack.c.bf16 %v1385_v39, %v1384_v16  ;;  %v2113_v22 = vpack.c.bf16 %v1403_v20, %v1402_v63  ;;  %v1404_v17 = vld [vmem:[%s3789_s1 + $0x3f0] sm:$0xff]  ;;  %v1389_v48 = vld [vmem:[%s3789_s1 + $0x378] sm:$0xff] }
 0x208   : > { %1480 = vmatprep.mubr.f32.mxu0 %v1012_v2  ;;  %2104 = vmatpush3.bf16.msra.mxu1 %v2103_v55  ;;  %v2087_v52 = vpack.c.bf16 %v1357_v60, %v1356_v1  ;;  %v174_v58 = vmul.f32 %v3230_v15, %v3835_v29  ;;  %v254_v18 = vmul.f32 %v3230_v15, %v3836_v4  ;;  %v1388_v10 = vld [vmem:[%s3789_s1 + $0x370] sm:$0xff]  ;;  %v2322_v11 = vunpack.i.l.bf16 %v3371_v41 }
 0x209   : > { %1481 = vmatmul.mubr.f32.gmra.mrb[4].mxu0 %v1000_v51  ;;  %2106 = vmatprep.subr.bf16.mxu1 %v2105_v62  ;;  %v333_v54 = vmul.f32 %v3207_v59, %v3837_v32  ;;  %v413_v55 = vmul.f32 %v3207_v59, %v3838_v19  ;;  %v2115_v35 = vpack.c.bf16 %v1387_v3, %v1386_v50  ;;  %v2333_v34 = vunpack.i.h.bf16 %v3398_v6 }
 0x20a   : > { %2080 = vmatpush3.bf16.msra.mxu0 %v2079_v21  ;;  %v571_v26 = vmul.f32 %v3215_v9, %v3118_v56  ;;  %v2117_v59 = vpack.c.bf16 %v1405_v33, %v1404_v17  ;;  %v2332_v21 = vunpack.i.l.bf16 %v3398_v6  ;;  %v2364_v2 = vunpack.i.l.bf16 %v3613_v30  ;;  %v2375_v51 = vpop.permute.xlu0 %2374 }
 0x20b   : > { %v3627_v14 = vpop.permute.xlu1 %636  ;;  %2082 = vmatprep.subr.bf16.mxu0 %v2081_v23  ;;  %v2119_v41 = vpack.c.bf16 %v1389_v48, %v1388_v10  ;;  %v2345_v16 = vunpack.i.h.bf16 %v3503_v25  ;;  %v2370_v39 = vunpack.i.l.bf16 %v2369_v31  ;;  %v2376_v63 = vunpack.i.l.bf16 %v2375_v51 }
 0x20c   : > { %2108 = vmatpush3.bf16.msra.mxu1 %v2107_v57  ;;  %v2339_v57 = vunpack.i.h.bf16 %v3446_v12  ;;  %v2365_v1 = vunpack.i.h.bf16 %v3613_v30  ;;  %v2377_v17 = vunpack.i.h.bf16 %v2375_v51  ;;  %v2354_v10 = vunpack.i.l.bf16 %v3560_v37 }
 0x20d   : > { %2110 = vmatprep.subr.bf16.mxu1 %v2109_v38  ;;  %v2338_v38 = vunpack.i.l.bf16 %v3446_v12 }
 0x20e   : > { %2084 = vmatpush3.bf16.msra.mxu0 %v2083_v36  ;;  %v2344_v36 = vunpack.i.l.bf16 %v3503_v25  ;;  %v1242_v25 = vsel %vm987_vm0, %v571_v26, %v2364_v2  ;;  %v2385_v26 = vpop.permute.xlu0 %2384 }
 0x20f   : > { %v2316_v49 = vpop.permute.xlu1 %2315  ;;  %2086 = vmatprep.subr.bf16.mxu0 %v2085_v61  ;;  %v1246_v30 = vsel %vm992_vm1, %v1242_v25, %v2370_v39 }
 0x210   : > { %v2318_v62 = vunpack.i.h.bf16 %v2316_v49  ;;  %v2317_v45 = vunpack.i.l.bf16 %v2316_v49  ;;  %2112 = vmatpush3.bf16.msra.mxu1 %v2111_v42  ;;  %v1250_v33 = vsel %vm997_vm2, %v1246_v30, %v2376_v63 }
 0x211   : > { %2114 = vmatprep.subr.bf16.mxu1 %v2113_v22  ;;  %v2371_v22 = vunpack.i.h.bf16 %v2369_v31  ;;  %v3840_v31 = vld [vmem:[#allocation16_spill] sm:$0xff] }
 0x212   : > { %v1028_v53 = vsel %vm987_vm0, %v413_v55, %v2317_v45  ;;  %v1016_v5 = vsel %vm987_vm0, %v333_v54, %v2318_v62  ;;  %2088 = vmatpush3.bf16.msra.mxu0 %v2087_v52  ;;  %v491_v52 = vmul.f32 %v3215_v9, %v2893_v8  ;;  %v3839_v54 = vld [vmem:[#allocation12_spill] sm:$0xff]  ;;  %v414_v49 = vmul.f32 %v3230_v15, %v3840_v31  ;;  %v2490_v31 = vld [vmem:[%s2567_s15 + $0x8] sm:$0xff] }
 0x213   : > { %v2326_v23 = vpop.permute.xlu1 %2325  ;;  %v1032_v56 = vsel %vm992_vm1, %v1028_v53, %v2322_v11  ;;  %v1020_v47 = vsel %vm992_vm1, %v1016_v5, %v2323_v24  ;;  %v334_v8 = vmul.f32 %v3230_v15, %v3839_v54  ;;  %v2395_v5 = vpop.permute.xlu0 %2394 }
 0x214   : > { %v2328_v27 = vunpack.i.h.bf16 %v2326_v23  ;;  %v2327_v40 = vunpack.i.l.bf16 %v2326_v23  ;;  %v1036_v7 = vsel %vm997_vm2, %v1032_v56, %v2332_v21  ;;  %v1024_v6 = vsel %vm997_vm2, %v1020_v47, %v2333_v34  ;;  %2116 = vmatpush3.bf16.msra.mxu1 %v2115_v35 }
 0x215   : > { %1565 = vmatprep.mubr.f32.mxu1 %v1036_v7  ;;  %2118 = vmatprep.subr.bf16.mxu1 %v2117_v59  ;;  %v1230_v29 = vsel %vm987_vm0, %v491_v52, %v2365_v1  ;;  %v2355_v35 = vunpack.i.h.bf16 %v3560_v37  ;;  %v731_v23 = vmul.f32 %v3215_v9, %v3589_v43  ;;  %v651_v56 = vmul.f32 %v3215_v9, %v3627_v14 }
 0x216   : > { %1566 = vmatmul.mubr.f32.gmra.mrb[4].mxu1 %v1024_v6  ;;  %v1005_v20 = vsel %vm987_vm0, %v254_v18, %v2327_v40  ;;  %v991_v61 = vsel %vm987_vm0, %v174_v58, %v2328_v27  ;;  %v1234_v58 = vsel %vm992_vm1, %v1230_v29, %v2371_v22  ;;  %v2387_v27 = vunpack.i.h.bf16 %v2385_v26 }
 0x217   : > { %v3681_v60 = vpop.permute.xlu1 %720  ;;  %v1009_v42 = vsel %vm992_vm1, %v1005_v20, %v2338_v38  ;;  %v996_v12 = vsel %vm992_vm1, %v991_v61, %v2339_v57  ;;  %v1238_v18 = vsel %vm997_vm2, %v1234_v58, %v2377_v17  ;;  %v2401_v37 = vpop.permute.xlu0 %2400  ;;  %v2386_v40 = vunpack.i.l.bf16 %v2385_v26 }
 0x218   : > { %v1013_v50 = vsel %vm997_vm2, %v1009_v42, %v2344_v36  ;;  %v1001_v3 = vsel %vm997_vm2, %v996_v12, %v2345_v16  ;;  %2120 = vmatpush3.bf16.msra.mxu1 %v2119_v41  ;;  %v2397_v7 = vunpack.i.h.bf16 %v2395_v5  ;;  %v2396_v6 = vunpack.i.l.bf16 %v2395_v5  ;;  %v3841_v16 = vld [vmem:[#allocation13_spill] sm:$0xff] }
 0x219   : > { %1485 = vmatprep.mubr.f32.mxu0 %v1013_v50  ;;  %v492_v39 = vmul.f32 %v3178_v46, %v3841_v16  ;;  %v3842_v36 = vld [vmem:[#allocation17_spill] sm:$0xff]  ;;  %v2403_v22 = vunpack.i.h.bf16 %v2401_v37  ;;  %v2402_v50 = vunpack.i.l.bf16 %v2401_v37  ;;  %v2491_v37 = vld [vmem:[%s2567_s15 + $0x10] sm:$0xff] }
 0x21a   : > { %1486 = vmatmul.mubr.f32.gmra.mrb[6].mxu0 %v1001_v3  ;;  %v572_v63 = vmul.f32 %v3178_v46, %v3842_v36 }
 0x21b   : > { %1640 = vmatprep.mubr.f32.mxu0 %v1250_v33  ;;  %v2407_v43 = vpop.permute.xlu0 %2406 }
 0x21c   : > { %v3694_v4 = vpop.permute.xlu1 %640  ;;  %v2409_v3 = vunpack.i.h.bf16 %v2407_v43  ;;  %v2408_v25 = vunpack.i.l.bf16 %v2407_v43 }
 0x21e   : > { %1641 = vmatmul.mubr.f32.vlgmr.msra.gmra.mrb[8].mxu0 %v1238_v18 }
 0x220   : > { %v2348_v32 = vpop.permute.xlu1 %2347  ;;  %v2417_v18 = vpop.permute.xlu0 %2416 }
 0x221   : > { %v2350_v19 = vunpack.i.h.bf16 %v2348_v32  ;;  %v2349_v55 = vunpack.i.l.bf16 %v2348_v32 }
 0x223   : > { %v1029_v62 = vsel %vm987_vm0, %v414_v49, %v2349_v55  ;;  %v1017_v45 = vsel %vm987_vm0, %v334_v8, %v2350_v19  ;;  %v732_v49 = vmul.f32 %v2490_v31, %v3681_v60  ;;  %v652_v19 = vmul.f32 %v2490_v31, %v3694_v4 }
 0x224   : > { %v2358_v48 = vpop.permute.xlu1 %2357  ;;  %v1033_v59 = vsel %vm992_vm1, %v1029_v62, %v2354_v10  ;;  %v1021_v34 = vsel %vm992_vm1, %v1017_v45, %v2355_v35  ;;  %v2419_v45 = vunpack.i.h.bf16 %v2417_v18  ;;  %v2418_v35 = vunpack.i.l.bf16 %v2417_v18 }
 0x225   : > { %v2360_v24 = vunpack.i.h.bf16 %v2358_v48  ;;  %v2359_v11 = vunpack.i.l.bf16 %v2358_v48 }
 0x227   : > { %v1037_v15 = vsel %vm997_vm2, %v1033_v59, %v2359_v11  ;;  %v1025_v21 = vsel %vm997_vm2, %v1021_v34, %v2360_v24 }
 0x228   : > { %1570 = vmatprep.mubr.f32.mxu1 %v1037_v15  ;;  %v3709_v53 = vpop.permute.xlu1 %724 }
 0x229   : > { %1571 = vmatmul.mubr.f32.gmra.mrb[6].mxu1 %v1025_v21 }
 0x22a   : > { %v2427_v54 = vpop.permute.xlu0 %2426 }
 0x22b   : > { %v2429_v10 = vunpack.i.h.bf16 %v2427_v54  ;;  %v2428_v48 = vunpack.i.l.bf16 %v2427_v54 }
 0x22d   : > { %v3711_v2 = vpop.permute.xlu1 %644 }
 0x22e   : > { %v653_v43 = vmul.f32 %v2491_v37, %v3711_v2 }
 0x22f   : > { %v2437_v11 = vpop.permute.xlu0 %2436 }
 0x231   : > { %v2380_v51 = vpop.permute.xlu1 %2379 }
 0x232   : > { %v2382_v47 = vunpack.i.h.bf16 %v2380_v51  ;;  %v2381_v41 = vunpack.i.l.bf16 %v2380_v51  ;;  %v493_v51 = vmul.f32 %v2491_v37, %v2905_v13 }
 0x234   : > { %v1254_v57 = vsel %vm987_vm0, %v651_v56, %v2382_v47  ;;  %v1266_v38 = vsel %vm987_vm0, %v731_v23, %v2381_v41  ;;  %v573_v23 = vmul.f32 %v2491_v37, %v3149_v0 }
 0x235   : > { %v2390_v20 = vpop.permute.xlu1 %2389  ;;  %v1270_v9 = vsel %vm992_vm1, %v1266_v38, %v2386_v40  ;;  %v1258_v14 = vsel %vm992_vm1, %v1254_v57, %v2387_v27  ;;  %v2439_v40 = vunpack.i.h.bf16 %v2437_v11 }
 0x236   : > { %v2392_v61 = vunpack.i.h.bf16 %v2390_v20  ;;  %v2391_v1 = vunpack.i.l.bf16 %v2390_v20  ;;  %v1274_v42 = vsel %vm997_vm2, %v1270_v9, %v2396_v6  ;;  %v1262_v12 = vsel %vm997_vm2, %v1258_v14, %v2397_v7 }
 0x237   : > { %1725 = vmatprep.mubr.f32.mxu1 %v1274_v42  ;;  %v2438_v7 = vunpack.i.l.bf16 %v2437_v11 }
 0x238   : > { %1726 = vmatmul.mubr.f32.vlgmr.msra.gmra.mrb[8].mxu1 %v1262_v12  ;;  %v1243_v46 = vsel %vm987_vm0, %v572_v63, %v2391_v1  ;;  %v1231_v52 = vsel %vm987_vm0, %v492_v39, %v2392_v61  ;;  %v733_v63 = vmul.f32 %v2491_v37, %v3709_v53 }
 0x239   : > { %v3729_v17 = vpop.permute.xlu1 %728  ;;  %v1247_v30 = vsel %vm992_vm1, %v1243_v46, %v2402_v50  ;;  %v1235_v33 = vsel %vm992_vm1, %v1231_v52, %v2403_v22 }
 0x23a   : > { %v1251_v29 = vsel %vm997_vm2, %v1247_v30, %v2408_v25  ;;  %v1239_v58 = vsel %vm997_vm2, %v1235_v33, %v2409_v3  ;;  %v2492_v33 = vld [vmem:[%s2567_s15 + $0x18] sm:$0xff] }
 0x23b   : > { %1645 = vmatprep.mubr.f32.mxu0 %v1251_v29  ;;  %v494_v29 = vmul.f32 %v2492_v33, %v2914_v44 }
 0x23c   : > { %1646 = vmatmul.mubr.f32.gmra.mrb[10].mxu0 %v1239_v58  ;;  %v574_v58 = vmul.f32 %v2492_v33, %v3168_v28 }
 0x23e   : > { %v3735_v32 = vpop.permute.xlu1 %648  ;;  %v2447_v56 = vpop.permute.xlu0 %2446 }
 0x23f   : > { %v2449_v14 = vunpack.i.h.bf16 %v2447_v56  ;;  %v2448_v61 = vunpack.i.l.bf16 %v2447_v56 }
 0x242   : > { %v2412_v8 = vpop.permute.xlu1 %2411 }
 0x243   : > { %v2414_v55 = vunpack.i.h.bf16 %v2412_v8  ;;  %v2413_v62 = vunpack.i.l.bf16 %v2412_v8 }
 0x245   : > { %v1267_v26 = vsel %vm987_vm0, %v732_v49, %v2413_v62  ;;  %v1255_v24 = vsel %vm987_vm0, %v652_v19, %v2414_v55 }
 0x246   : > { %v2422_v59 = vpop.permute.xlu1 %2421  ;;  %v1271_v34 = vsel %vm992_vm1, %v1267_v26, %v2418_v35  ;;  %v1259_v15 = vsel %vm992_vm1, %v1255_v24, %v2419_v45  ;;  %v734_v26 = vmul.f32 %v2492_v33, %v3729_v17  ;;  %v654_v24 = vmul.f32 %v2492_v33, %v3735_v32 }
 0x247   : > { %v1275_v60 = vsel %vm997_vm2, %v1271_v34, %v2428_v48  ;;  %v1263_v4 = vsel %vm997_vm2, %v1259_v15, %v2429_v10  ;;  %v2424_v21 = vunpack.i.h.bf16 %v2422_v59  ;;  %v2423_v5 = vunpack.i.l.bf16 %v2422_v59 }
 0x248   : > { %1730 = vmatprep.mubr.f32.mxu1 %v1275_v60  ;;  %v2457_v39 = vpop.permute.xlu0 %2456 }
 0x249   : > { %1731 = vmatmul.mubr.f32.gmra.mrb[10].mxu1 %v1263_v4  ;;  %v1244_v6 = vsel %vm987_vm0, %v573_v23, %v2423_v5  ;;  %v1232_v57 = vsel %vm987_vm0, %v493_v51, %v2424_v21  ;;  %v2459_v1 = vunpack.i.h.bf16 %v2457_v39  ;;  %v2458_v42 = vunpack.i.l.bf16 %v2457_v39 }
 0x24a   : > { %v2432_v47 = vpop.permute.xlu1 %2431 }
 0x24b   : > { %v2434_v41 = vunpack.i.h.bf16 %v2432_v47  ;;  %v2433_v27 = vunpack.i.l.bf16 %v2432_v47 }
 0x24d   : > { %v1248_v38 = vsel %vm992_vm1, %v1244_v6, %v2433_v27  ;;  %v1236_v16 = vsel %vm992_vm1, %v1232_v57, %v2434_v41  ;;  %v2467_v30 = vpop.permute.xlu0 %2466 }
 0x24e   : > { %v2442_v36 = vpop.permute.xlu1 %2441  ;;  %v1252_v13 = vsel %vm997_vm2, %v1248_v38, %v2438_v7  ;;  %v1240_v0 = vsel %vm997_vm2, %v1236_v16, %v2439_v40  ;;  %v2469_v31 = vunpack.i.h.bf16 %v2467_v30  ;;  %v2468_v49 = vunpack.i.l.bf16 %v2467_v30 }
 0x24f   : > { %v2444_v20 = vunpack.i.h.bf16 %v2442_v36  ;;  %v2443_v9 = vunpack.i.l.bf16 %v2442_v36  ;;  %1650 = vmatprep.mubr.f32.mxu0 %v1252_v13 }
 0x250   : > { %1651 = vmatmul.mubr.f32.gmra.mrb[12].mxu0 %v1240_v0 }
 0x251   : > { %v1268_v12 = vsel %vm987_vm0, %v733_v63, %v2443_v9  ;;  %v1256_v22 = vsel %vm987_vm0, %v653_v43, %v2444_v20 }
 0x252   : > { %v2452_v50 = vpop.permute.xlu1 %2451  ;;  %v1272_v3 = vsel %vm992_vm1, %v1268_v12, %v2448_v61  ;;  %v1260_v53 = vsel %vm992_vm1, %v1256_v22, %v2449_v14 }
 0x253   : > { %v1276_v2 = vsel %vm997_vm2, %v1272_v3, %v2458_v42  ;;  %v1264_v25 = vsel %vm997_vm2, %v1260_v53, %v2459_v1  ;;  %v2454_v46 = vunpack.i.h.bf16 %v2452_v50  ;;  %v2453_v52 = vunpack.i.l.bf16 %v2452_v50 }
 0x254   : > { %1735 = vmatprep.mubr.f32.mxu1 %v1276_v2 }
 0x255   : > { %1736 = vmatmul.mubr.f32.gmra.mrb[12].mxu1 %v1264_v25  ;;  %v1245_v19 = vsel %vm987_vm0, %v574_v58, %v2453_v52  ;;  %v1233_v55 = vsel %vm987_vm0, %v494_v29, %v2454_v46 }
 0x256   : > { %v2462_v18 = vpop.permute.xlu1 %2461 }
 0x257   : > { %v2464_v54 = vunpack.i.h.bf16 %v2462_v18  ;;  %v2463_v8 = vunpack.i.l.bf16 %v2462_v18  ;;  %v2477_v11 = vpop.permute.xlu0 %2476 }
 0x258   : > { %v2479_v15 = vunpack.i.h.bf16 %v2477_v11  ;;  %v2478_v60 = vunpack.i.l.bf16 %v2477_v11 }
 0x259   : > { %v1249_v62 = vsel %vm992_vm1, %v1245_v19, %v2463_v8  ;;  %v1237_v45 = vsel %vm992_vm1, %v1233_v55, %v2464_v54 }
 0x25a   : > { %v2472_v35 = vpop.permute.xlu1 %2471  ;;  %v1253_v10 = vsel %vm997_vm2, %v1249_v62, %v2468_v49  ;;  %v1241_v44 = vsel %vm997_vm2, %v1237_v45, %v2469_v31 }
 0x25b   : > { %1655 = vmatprep.mubr.f32.mxu0 %v1253_v10  ;;  %v2474_v28 = vunpack.i.h.bf16 %v2472_v35  ;;  %v2473_v48 = vunpack.i.l.bf16 %v2472_v35 }
 0x25c   : > { %1656 = vmatmul.mubr.f32.gmra.mrb[14].mxu0 %v1241_v44 }
 0x25d   : > { %v1269_v59 = vsel %vm987_vm0, %v734_v26, %v2473_v48  ;;  %v1257_v34 = vsel %vm987_vm0, %v654_v24, %v2474_v28 }
 0x25e   : > { %v1273_v37 = vsel %vm992_vm1, %v1269_v59, %v2478_v60  ;;  %v1261_v51 = vsel %vm992_vm1, %v1257_v34, %v2479_v15 }
 0x261   : > { %v2482_v4 = vpop.permute.xlu1 %2481 }
 0x262   : > { %v2484_v21 = vunpack.i.h.bf16 %v2482_v4  ;;  %v2483_v5 = vunpack.i.l.bf16 %v2482_v4 }
 0x264   : > { %v1277_v23 = vsel %vm997_vm2, %v1273_v37, %v2483_v5  ;;  %v1265_v17 = vsel %vm997_vm2, %v1261_v51, %v2484_v21 }
 0x265   : > { %1740 = vmatprep.mubr.f32.mxu1 %v1277_v23 }
 0x266   : > { %1741 = vmatmul.mubr.f32.gmra.mrb[14].mxu1 %v1265_v17 }
 0x2c7   : > { %v1849_v32 = vpop.f32.mrb[0].mxu0 }
 0x2c8   : > { %v1850_v56 = vpop.f32.mrb[1].mxu0 }
 0x2c9   : > { %v1851_v47 = vadd.f32 %v1850_v56, %v1849_v32 }
 0x2ce   : > { %v1893_v41 = vpop.f32.mrb[0].mxu1 }
 0x2cf   : > { %v1894_v27 = vpop.f32.mrb[1].mxu1 }
 0x2d0   : > { %v1895_v40 = vadd.f32 %v1894_v27, %v1893_v41 }
 0x2d2   : > { %v1558_v7 = vadd.f32 %v1895_v40, %v1851_v47 }
 0x2d3   : > { %v1852_v6 = vpop.f32.mrb[2].mxu0 }
 0x2d4   : > { %v1853_v57 = vpop.f32.mrb[3].mxu0 }
 0x2d5   : > { %v1854_v38 = vadd.f32 %v1853_v57, %v1852_v6 }
 0x2d8   : > { %v1896_v16 = vpop.f32.mrb[2].mxu1 }
 0x2d9   : > { %v1897_v39 = vpop.f32.mrb[3].mxu1 }
 0x2da   : > { %v1898_v36 = vadd.f32 %v1897_v39, %v1896_v16 }
 0x2dc   : > { %v1563_v13 = vadd.f32 %v1898_v36, %v1854_v38  ;;  %v1855_v0 = vpop.f32.mrb[4].mxu0 }
 0x2dd   : > { %v1856_v63 = vpop.f32.mrb[5].mxu0 }
 0x2de   : > { %v1857_v43 = vadd.f32 %v1856_v63, %v1855_v0 }
 0x2e9   : > { %v1899_v20 = vpop.f32.mrb[4].mxu1 }
 0x2ea   : > { %v1900_v9 = vpop.f32.mrb[5].mxu1 }
 0x2eb   : > { %v1901_v14 = vadd.f32 %v1900_v9, %v1899_v20 }
 0x2ed   : > { %v1568_v61 = vadd.f32 %v1901_v14, %v1857_v43  ;;  %v1858_v1 = vpop.f32.mrb[6].mxu0 }
 0x2ee   : > { %v1859_v42 = vpop.f32.mrb[7].mxu0 }
 0x2ef   : > { %v1860_v12 = vadd.f32 %v1859_v42, %v1858_v1 }
 0x2f1   : > { %v1937_v22 = vpop.f32.mrb[8].mxu0 }
 0x2f2   : > { %v1938_v50 = vpop.f32.mrb[9].mxu0 }
 0x2f3   : > { %v1939_v3 = vadd.f32 %v1938_v50, %v1937_v22 }
 0x2f5   : > { %v1643_v53 = vadd.f32 %v1939_v3, %v1558_v7 }
 0x2fc   : > { %v1902_v2 = vpop.f32.mrb[6].mxu1 }
 0x2fd   : > { %v1903_v25 = vpop.f32.mrb[7].mxu1 }
 0x2fe   : > { %v1904_v46 = vadd.f32 %v1903_v25, %v1902_v2 }
 0x300   : > { %v1573_v52 = vadd.f32 %v1904_v46, %v1860_v12 }
 0x30b   : > { %v1981_v30 = vpop.f32.mrb[8].mxu1 }
 0x30c   : > { %v1982_v33 = vpop.f32.mrb[9].mxu1 }
 0x30d   : > { %v1983_v29 = vadd.f32 %v1982_v33, %v1981_v30 }
 0x30f   : > { %v1728_v58 = vadd.f32 %v1983_v29, %v1643_v53  ;;  %v1940_v18 = vpop.f32.mrb[10].mxu0 }
 0x310   : > { %v1941_v54 = vpop.f32.mrb[11].mxu0 }
 0x311   : > { %1746 = vst [vmem:[%s145_s18] sm:$0xff] %v1728_v58  ;;  %v1942_v8 = vadd.f32 %v1941_v54, %v1940_v18 }
 0x313   : > { %v1648_v31 = vadd.f32 %v1942_v8, %v1563_v13 }
 0x31c   : > { %v1984_v49 = vpop.f32.mrb[10].mxu1 }
 0x31d   : > { %v1985_v19 = vpop.f32.mrb[11].mxu1 }
 0x31e   : > { %v1986_v55 = vadd.f32 %v1985_v19, %v1984_v49 }
 0x320   : > { %v1733_v62 = vadd.f32 %v1986_v55, %v1648_v31 }
 0x322   : > { %1747 = vst [vmem:[%s145_s18 + $0x8] sm:$0xff] %v1733_v62 }
 0x323   : > { %v1943_v45 = vpop.f32.mrb[12].mxu0 }
 0x324   : > { %v1944_v35 = vpop.f32.mrb[13].mxu0 }
 0x325   : > { %v1945_v10 = vadd.f32 %v1944_v35, %v1943_v45 }
 0x327   : > { %v1653_v44 = vadd.f32 %v1945_v10, %v1568_v61 }
 0x328   : > { %v1987_v28 = vpop.f32.mrb[12].mxu1 }
 0x329   : > { %v1988_v48 = vpop.f32.mrb[13].mxu1 }
 0x32a   : > { %v1989_v26 = vadd.f32 %v1988_v48, %v1987_v28 }
 0x32c   : > { %v1738_v24 = vadd.f32 %v1989_v26, %v1653_v44 }
 0x32e   : > { %1748 = vst [vmem:[%s145_s18 + $0x10] sm:$0xff] %v1738_v24 }
 0x32f   : > { %v1946_v11 = vpop.f32.mrb[14].mxu0 }
 0x330   : > { %v1947_v59 = vpop.f32.mrb[15].mxu0 }
 0x331   : > { %v1948_v34 = vadd.f32 %v1947_v59, %v1946_v11 }
 0x333   : > { %v1658_v15 = vadd.f32 %v1948_v34, %v1573_v52 }
 0x339   : > { %v1990_v60 = vpop.f32.mrb[14].mxu1 }
 0x33a   : > { %v1991_v4 = vpop.f32.mrb[15].mxu1 }
 0x33b   : > { %v1992_v21 = vadd.f32 %v1991_v4, %v1990_v60 }
 0x33d   : > { %v1743_v5 = vadd.f32 %v1992_v21, %v1658_v15 }
 0x33f   : > { %1749 = vst [vmem:[%s145_s18 + $0x18] sm:$0xff] %v1743_v5 }
 0x340 PF: > { %s12_s9 = sadd.s32 1, %s2499_s9  }
 0x341   : > { %p9_p4 = scmp.ge.s32.totalorder %s12_s9, 4  }
 0x343   :  { %11 = sbr.rel (!%p9_p4) target bundleno = 1 (0x1), region = 58 }

</bundles_post_ra>
